<compile_context>
chip_gen: v5e
topology: v5e:2x2
jax: 0.10.0
libtpu: 0.0.40
codegen_flags: <defaults>
</compile_context>

<pallas_src>
import jax
import jax.numpy as jnp
from jax.experimental import pallas as pl
from jax.experimental.pallas import tpu as pltpu


# --------------------------------------------------------------------------
# Single fused kernel: GCN (2 layers, all T snapshots) + 2-layer LSTM + head.
# --------------------------------------------------------------------------
def gcn_rnn_fused_kernel(x_ref, a_ref, asub_ref, w1_ref, b1_ref, gmask_ref,
                         wfold_ref, bfold_ref, whh0_ref, lmask_ref,
                         w1cat_ref, b1cat_ref, wmh_ref, wmc_ref,
                         sel0_ref, sel1_ref, hb_ref, o_ref):
    bf16, f32 = jnp.bfloat16, jnp.float32
    T = gmask_ref.shape[0]
    N = a_ref.shape[0]
    B = asub_ref.shape[0]
    H = whh0_ref.shape[0]

    a = a_ref[...]                                    # (N, N)   bf16
    asub = asub_ref[...]                              # (B, N)   bf16
    whh0 = whh0_ref[...]                              # (H, 4H)  bf16
    w1cat = w1cat_ref[...]                            # (2H, 4H) bf16
    wfold = wfold_ref[...]                            # (H1, 4H) bf16
    b1 = b1_ref[...]                                  # (1, H1)  f32
    bfold = bfold_ref[...]                            # (1, 4H)  f32
    b1cat = b1cat_ref[...]                            # (1, 4H)  f32

    # GCN layer-1 input projection for ALL snapshots in one MXU push
    # (reassociated A_hat @ (X @ W1); X flattened to (T*N, Fin) host-side).
    xw1 = jnp.dot(x_ref[...], w1_ref[...], preferred_element_type=f32)   # (T*N, H1)

    # Lane mask selecting the tanh gate (PyTorch gate order i, f, g, o);
    # hoisted out of the unrolled loop.
    lane = jax.lax.broadcasted_iota(jnp.int32, (B, 4 * H), 1)
    tanh_lane = (lane >= 2 * H) & (lane < 3 * H)

    def cell(gates, c_prev):
        # One full-width sigmoid + one full-width tanh (EUP), lane-selected.
        act = jnp.where(tanh_lane, jnp.tanh(gates), jax.nn.sigmoid(gates))
        i = act[:, 0 * H:1 * H]
        f = act[:, 1 * H:2 * H]
        g = act[:, 2 * H:3 * H]
        o = act[:, 3 * H:4 * H]
        c = f * c_prev + i * g
        h = o * jnp.tanh(c)
        return h, c

    h0 = jnp.zeros((B, H), f32)
    c0 = jnp.zeros((B, H), f32)
    h1 = jnp.zeros((B, H), f32)
    c1 = jnp.zeros((B, H), f32)

    # T is small and static: fully unrolled recurrence (carried in vregs).
    for t in range(T):
        # ---- GCN layer 1: propagate, bias, leaky_relu, dropout (training) ----
        p = xw1[t * N:(t + 1) * N, :]                                   # (N, H1) f32
        h = jnp.dot(a, p.astype(bf16), preferred_element_type=f32) + b1
        h = jnp.where(h >= 0.0, h, 0.01 * h)                            # F.leaky_relu
        h = h * gmask_ref[t]                                            # F.dropout
        # ---- GCN layer 2 restricted to training nodes, folded with the
        #      LSTM layer-0 input projection: (A_sub @ h) @ (W2 @ Wih0) + b ----
        z = jnp.dot(asub, h.astype(bf16), preferred_element_type=f32)   # (B, H1)
        pre = jnp.dot(z.astype(bf16), wfold,
                      preferred_element_type=f32) + bfold               # (B, 4H)
        # ---- LSTM layer 0 ----
        gates0 = pre + jnp.dot(h0.astype(bf16), whh0, preferred_element_type=f32)
        h0, c0 = cell(gates0, c0)
        # ---- inter-layer dropout + LSTM layer 1 (single stacked matmul) ----
        x1 = h0 * lmask_ref[t]
        xcat = jnp.concatenate([x1, h1], axis=1)                        # (B, 2H)
        gates1 = jnp.dot(xcat.astype(bf16), w1cat,
                         preferred_element_type=f32) + b1cat
        h1, c1 = cell(gates1, c1)

    # ---- head: Linear(2*L*H -> 1) on PyTorch's raw row-major reshape of
    #      hn/cn ((L, B, H) -> (B, L*H)), reproduced via host-prepared
    #      Wmat / Sel matrices (no in-kernel reshape). ----
    s0 = jnp.sum(h0 * wmh_ref[...] + c0 * wmc_ref[...], axis=1, keepdims=True)   # (B,1)
    s1 = jnp.sum(h1 * wmh_ref[...] + c1 * wmc_ref[...], axis=1, keepdims=True)
    o_ref[...] = (jnp.dot(sel0_ref[...], s0, preferred_element_type=f32)
                  + jnp.dot(sel1_ref[...], s1, preferred_element_type=f32)
                  + hb_ref[...])


def gcn_rnn_fused_forward(x_flat, a_hat, a_sub, w1, b1, gcn_mask, w_fold, b_fold,
                          whh0, lstm_mask, w1cat, b1cat, wmh, wmc, sel0, sel1,
                          head_b):
    B = a_sub.shape[0]
    args = (x_flat, a_hat, a_sub, w1, b1, gcn_mask, w_fold, b_fold, whh0,
            lstm_mask, w1cat, b1cat, wmh, wmc, sel0, sel1, head_b)
    return pl.pallas_call(
        gcn_rnn_fused_kernel,
        out_shape=jax.ShapeDtypeStruct((B, 1), jnp.float32),
        in_specs=[pl.BlockSpec(memory_space=pltpu.MemorySpace.VMEM)
                  for _ in range(len(args))],
        out_specs=pl.BlockSpec(memory_space=pltpu.MemorySpace.VMEM),
    )(*args)


# --------------------------------------------------------------------------
# Full GCNRNNNet forward (host-side prep is tiny; the hot path is one kernel)
# --------------------------------------------------------------------------
def gcn_rnn_net_forward(params, a_hat, x_seq, idx_subset, masks):
    bf16, f32 = jnp.bfloat16, jnp.float32
    T, N, Fin = x_seq.shape
    B = int(idx_subset.shape[0])
    Hl = params["whh0"].shape[0]
    L = 2                       # two stacked LSTM layers (fixed by kernel structure)
    assert B % L == 0, "raw-flatten head decomposition requires B % L == 0"

    a_sub = a_hat[idx_subset, :]                     # (B, N) rows for 2nd propagation
    x_flat = x_seq.reshape(T * N, Fin)               # batched layer-1 projection input

    # Exact fold of GCN layer-2 weight into the LSTM-0 input projection (f32
    # fold, single cast to bf16 at the call site).
    w_fold = params["gcn_w2"] @ params["wih0"]                         # (H1, 4Hl)
    b_fold = params["gcn_b2"] @ params["wih0"] + params["blstm0"]      # (1, 4Hl)
    # Stacked LSTM layer-1 weights: gates1 = [x1, h1] @ [Wih1; Whh1] + b.
    w1cat = jnp.concatenate([params["wih1"], params["whh1"]], axis=0)  # (2Hl, 4Hl)

    # Re-lay-out the head weights so the kernel reproduces PyTorch's raw
    # row-major reshape of hn/cn ((L, B, H) -> (B, L*H)) with no in-kernel
    # reshape:  head row r uses layer l = r // (B//L), batch rows
    # b = (r mod (B//L))*L .. +L-1, and weight chunk (b mod L).
    LH = L * Hl
    w_h = params["head_w"][:LH, 0]
    w_c = params["head_w"][LH:, 0]
    wmh = jnp.tile(w_h.reshape(L, Hl), (B // L, 1)).astype(f32)        # (B, Hl)
    wmc = jnp.tile(w_c.reshape(L, Hl), (B // L, 1)).astype(f32)
    r_idx = jnp.arange(B)[:, None]
    b_idx = jnp.arange(B)[None, :]
    sel0 = (r_idx == b_idx // L).astype(f32)                           # (B, B)
    sel1 = (r_idx == b_idx // L + B // L).astype(f32)

    out = gcn_rnn_fused_forward(
        x_flat.astype(bf16), a_hat.astype(bf16), a_sub.astype(bf16),
        params["gcn_w1"].astype(bf16), params["gcn_b1"], masks["gcn_drop"],
        w_fold.astype(bf16), b_fold, params["whh0"].astype(bf16),
        masks["lstm_drop"], w1cat.astype(bf16), params["blstm1"],
        wmh, wmc, sel0, sel1, params["head_b"])                        # (B, 1)
    return out.reshape(-1)


# --------------------------------------------------------------------------
# Pure-JAX reference (standard op ordering; mirrors only the bf16 MXU-operand
# casts, NOT the kernel's fold/reassociation — so it checks the restructuring).
# --------------------------------------------------------------------------
def reference_forward(params, a_hat, x_seq, idx_subset, masks):
    bf16, f32 = jnp.bfloat16, jnp.float32
    A = a_hat.astype(bf16)

    def gcn_one(x_t, mask_t):
        h = jnp.dot(A, x_t.astype(bf16), preferred_element_type=f32)
        h = jnp.dot(h.astype(bf16), params["gcn_w1"].astype(bf16),
                    preferred_element_type=f32) + params["gcn_b1"]
        h = jnp.where(h >= 0.0, h, 0.01 * h) * mask_t
        h2 = jnp.dot(A, h.astype(bf16), preferred_element_type=f32)
        return jnp.dot(h2.astype(bf16), params["gcn_w2"].astype(bf16),
                       preferred_element_type=f32) + params["gcn_b2"]

    gcn_out = jax.vmap(gcn_one)(x_seq, masks["gcn_drop"])         # (T, N, Dg)
    seq = gcn_out[:, idx_subset, :]                               # (T, B, Dg)

    def lstm_layer_ref(xs, wih, whh, b):
        Hl_ = whh.shape[0]
        B_ = xs.shape[1]

        def step(carry, x_t):
            h, c = carry
            gates = (jnp.dot(x_t.astype(bf16), wih.astype(bf16),
                             preferred_element_type=f32)
                     + jnp.dot(h.astype(bf16), whh.astype(bf16),
                               preferred_element_type=f32) + b)
            i = jax.nn.sigmoid(gates[:, :Hl_])
            f = jax.nn.sigmoid(gates[:, Hl_:2 * Hl_])
            g = jnp.tanh(gates[:, 2 * Hl_:3 * Hl_])
            o = jax.nn.sigmoid(gates[:, 3 * Hl_:])
            c = f * c + i * g
            h = o * jnp.tanh(c)
            return (h, c), h

        init = (jnp.zeros((B_, Hl_), f32), jnp.zeros((B_, Hl_), f32))
        (hT, cT), hs = jax.lax.scan(step, init, xs)
        return hs, hT, cT

    h0s, h0T, c0T = lstm_layer_ref(seq, params["wih0"], params["whh0"], params["blstm0"])
    h1s, h1T, c1T = lstm_layer_ref(h0s * masks["lstm_drop"],
                                   params["wih1"], params["whh1"], params["blstm1"])
    hn = jnp.stack([h0T, h1T], axis=0)                            # (L, B, H)
    cn = jnp.stack([c0T, c1T], axis=0)
    Ln, Bn, Hn = hn.shape
    head_in = jnp.concatenate([hn.reshape(Bn, Ln * Hn), cn.reshape(Bn, Ln * Hn)], axis=1)
    return (jnp.dot(head_in, params["head_w"]) + params["head_b"]).reshape(-1)


if __name__ == "__main__":
    # Small deterministic configuration
    N = 16          # nodes per graph snapshot
    Fin = 8         # num_of_features
    H1 = 16         # gcn_hidden_sizes[0]
    Dg = 16         # gcn_latent_dim
    T = 6           # number of graph snapshots (len(data))
    Hl = 32         # lstm_hidden_size
    L = 2           # lstm_num_layers
    gcn_p = 0.5     # gcn_dropout_rate
    lstm_p = 0.25   # lstm_dropout_rate
    idx_subset = jnp.arange(8)     # training-node subset
    B = int(idx_subset.shape[0])

    key = jax.random.PRNGKey(0)
    ks = jax.random.split(key, 14)

    # --- graph: bidirectional ring; GCNConv-style symmetric normalization + self-loops ---
    src = jnp.arange(N)
    dst = (src + 1) % N
    A = jnp.zeros((N, N), jnp.float32).at[src, dst].set(1.0).at[dst, src].set(1.0)
    A = A + jnp.eye(N, dtype=jnp.float32)
    dinv = 1.0 / jnp.sqrt(A.sum(axis=1))
    A_hat = (dinv[:, None] * A * dinv[None, :]).astype(jnp.float32)   # single (N, N)

    # --- node features per snapshot ---
    x_seq = jax.random.normal(ks[0], (T, N, Fin), jnp.float32)

    # --- parameters (deterministic synthetic init) ---
    s = 0.2
    params = {
        "gcn_w1": s * jax.random.normal(ks[1], (Fin, H1), jnp.float32),
        "gcn_b1": s * jax.random.normal(ks[2], (1, H1), jnp.float32),
        "gcn_w2": s * jax.random.normal(ks[3], (H1, Dg), jnp.float32),
        "gcn_b2": s * jax.random.normal(ks[4], (1, Dg), jnp.float32),
        # LSTM layer 0: weights pre-transposed to (Din, 4H); bias = b_ih + b_hh
        "wih0": s * jax.random.normal(ks[5], (Dg, 4 * Hl), jnp.float32),
        "whh0": s * jax.random.normal(ks[6], (Hl, 4 * Hl), jnp.float32),
        "blstm0": s * jax.random.normal(ks[7], (1, 4 * Hl), jnp.float32),
        # LSTM layer 1
        "wih1": s * jax.random.normal(ks[8], (Hl, 4 * Hl), jnp.float32),
        "whh1": s * jax.random.normal(ks[9], (Hl, 4 * Hl), jnp.float32),
        "blstm1": s * jax.random.normal(ks[10], (1, 4 * Hl), jnp.float32),
        # head: Linear(2*L*Hl -> 1), weight stored transposed
        "head_w": s * jax.random.normal(ks[11], (2 * L * Hl, 1), jnp.float32),
        "head_b": s * jax.random.normal(ks[12], (1, 1), jnp.float32),
    }

    # --- deterministic dropout masks (PyTorch forward runs in training mode) ---
    mk = jax.random.split(ks[13], 2)
    gcn_keep = jax.random.bernoulli(mk[0], 1.0 - gcn_p, (T, N, H1))
    lstm_keep = jax.random.bernoulli(mk[1], 1.0 - lstm_p, (T, B, Hl))
    masks = {
        "gcn_drop": gcn_keep.astype(jnp.float32) / (1.0 - gcn_p),
        "lstm_drop": lstm_keep.astype(jnp.float32) / (1.0 - lstm_p),
    }

    fwd = jax.jit(gcn_rnn_net_forward)
    out = jax.block_until_ready(fwd(params, A_hat, x_seq, idx_subset, masks))
    assert out.shape == (B,), out.shape
    assert bool(jnp.all(jnp.isfinite(out)))

    ref = jax.block_until_ready(reference_forward(params, A_hat, x_seq, idx_subset, masks))
    err = float(jnp.max(jnp.abs(out - ref)))
    assert err < 5e-2, f"mismatch vs reference: max abs err = {err}"

    print("KERNEL_OK")
</pallas_src>

<mosaic_0001>
module attributes {stable_mosaic.version = 11 : i64} {
  func.func @gcn_rnn_fused_kernel(%arg0: memref<96x8xbf16, #tpu.memory_space<vmem>>, %arg1: memref<16x16xbf16, #tpu.memory_space<vmem>>, %arg2: memref<8x16xbf16, #tpu.memory_space<vmem>>, %arg3: memref<8x16xbf16, #tpu.memory_space<vmem>>, %arg4: memref<1x16xf32, #tpu.memory_space<vmem>>, %arg5: memref<6x16x16xf32, #tpu.memory_space<vmem>>, %arg6: memref<16x128xbf16, #tpu.memory_space<vmem>>, %arg7: memref<1x128xf32, #tpu.memory_space<vmem>>, %arg8: memref<32x128xbf16, #tpu.memory_space<vmem>>, %arg9: memref<6x8x32xf32, #tpu.memory_space<vmem>>, %arg10: memref<64x128xbf16, #tpu.memory_space<vmem>>, %arg11: memref<1x128xf32, #tpu.memory_space<vmem>>, %arg12: memref<8x32xf32, #tpu.memory_space<vmem>>, %arg13: memref<8x32xf32, #tpu.memory_space<vmem>>, %arg14: memref<8x8xf32, #tpu.memory_space<vmem>>, %arg15: memref<8x8xf32, #tpu.memory_space<vmem>>, %arg16: memref<1x1xf32, #tpu.memory_space<vmem>>, %arg17: memref<8x1xf32, #tpu.memory_space<vmem>>) attributes {dimension_semantics = [], scalar_prefetch = 0 : i64, scratch_operands = 0 : i64, tpu.core_type = #tpu.core_type<tc>} {
    %c0 = arith.constant 0 : index
    %c0_0 = arith.constant 0 : index
    %0 = vector.load %arg1[%c0, %c0_0] : memref<16x16xbf16, #tpu.memory_space<vmem>>, vector<16x16xbf16>
    %c0_1 = arith.constant 0 : index
    %c0_2 = arith.constant 0 : index
    %1 = vector.load %arg2[%c0_1, %c0_2] : memref<8x16xbf16, #tpu.memory_space<vmem>>, vector<8x16xbf16>
    %c0_3 = arith.constant 0 : index
    %c0_4 = arith.constant 0 : index
    %2 = vector.load %arg8[%c0_3, %c0_4] : memref<32x128xbf16, #tpu.memory_space<vmem>>, vector<32x128xbf16>
    %c0_5 = arith.constant 0 : index
    %c0_6 = arith.constant 0 : index
    %3 = vector.load %arg10[%c0_5, %c0_6] : memref<64x128xbf16, #tpu.memory_space<vmem>>, vector<64x128xbf16>
    %c0_7 = arith.constant 0 : index
    %c0_8 = arith.constant 0 : index
    %4 = vector.load %arg6[%c0_7, %c0_8] : memref<16x128xbf16, #tpu.memory_space<vmem>>, vector<16x128xbf16>
    %c0_9 = arith.constant 0 : index
    %c0_10 = arith.constant 0 : index
    %5 = vector.load %arg4[%c0_9, %c0_10] : memref<1x16xf32, #tpu.memory_space<vmem>>, vector<1x16xf32>
    %c0_11 = arith.constant 0 : index
    %c0_12 = arith.constant 0 : index
    %6 = vector.load %arg7[%c0_11, %c0_12] : memref<1x128xf32, #tpu.memory_space<vmem>>, vector<1x128xf32>
    %c0_13 = arith.constant 0 : index
    %c0_14 = arith.constant 0 : index
    %7 = vector.load %arg11[%c0_13, %c0_14] : memref<1x128xf32, #tpu.memory_space<vmem>>, vector<1x128xf32>
    %c0_15 = arith.constant 0 : index
    %c0_16 = arith.constant 0 : index
    %8 = vector.load %arg0[%c0_15, %c0_16] : memref<96x8xbf16, #tpu.memory_space<vmem>>, vector<96x8xbf16>
    %c0_17 = arith.constant 0 : index
    %c0_18 = arith.constant 0 : index
    %9 = vector.load %arg3[%c0_17, %c0_18] : memref<8x16xbf16, #tpu.memory_space<vmem>>, vector<8x16xbf16>
    %cst = arith.constant dense<0.000000e+00> : vector<96x16xf32>
    %10 = tpu.matmul %8, %9, %cst {dimension_numbers = #tpu.dot_dimension_numbers<[1], [0], [0], [1], [0, 0, 1, 1], [], []>} : vector<96x8xbf16>, vector<8x16xbf16>, vector<96x16xf32> -> vector<96x16xf32>
    %11 = tpu.iota {dimensions = array<i32: 1>} : vector<8x128xi32>
    %c64_i32 = arith.constant 64 : i32
    %12 = vector.broadcast %c64_i32 : i32 to vector<8x128xi32>
    %13 = arith.cmpi sge, %11, %12 : vector<8x128xi32>
    %c96_i32 = arith.constant 96 : i32
    %14 = vector.broadcast %c96_i32 : i32 to vector<8x128xi32>
    %15 = arith.cmpi slt, %11, %14 : vector<8x128xi32>
    %16 = arith.andi %13, %15 : vector<8x128xi1>
    %cst_19 = arith.constant 0.000000e+00 : f32
    %17 = vector.broadcast %cst_19 : f32 to vector<8x32xf32>
    %cst_20 = arith.constant 0.000000e+00 : f32
    %18 = vector.broadcast %cst_20 : f32 to vector<8x32xf32>
    %cst_21 = arith.constant 0.000000e+00 : f32
    %19 = vector.broadcast %cst_21 : f32 to vector<8x32xf32>
    %cst_22 = arith.constant 0.000000e+00 : f32
    %20 = vector.broadcast %cst_22 : f32 to vector<8x32xf32>
    %21 = vector.extract_strided_slice %10 {offsets = [0, 0], sizes = [16, 16], strides = [1, 1]} : vector<96x16xf32> to vector<16x16xf32>
    %22 = arith.truncf %21 : vector<16x16xf32> to vector<16x16xbf16>
    %cst_23 = arith.constant dense<0.000000e+00> : vector<16x16xf32>
    %23 = tpu.matmul %0, %22, %cst_23 {dimension_numbers = #tpu.dot_dimension_numbers<[1], [0], [0], [1], [0, 0, 1, 1], [], []>} : vector<16x16xbf16>, vector<16x16xbf16>, vector<16x16xf32> -> vector<16x16xf32>
    %24 = vector.broadcast %5 : vector<1x16xf32> to vector<16x16xf32>
    %25 = arith.addf %23, %24 : vector<16x16xf32>
    %cst_24 = arith.constant 0.000000e+00 : f32
    %26 = vector.broadcast %cst_24 : f32 to vector<16x16xf32>
    %27 = arith.cmpf oge, %25, %26 : vector<16x16xf32>
    %cst_25 = arith.constant 0.00999999977 : f32
    %28 = vector.broadcast %cst_25 : f32 to vector<16x16xf32>
    %29 = arith.mulf %28, %25 : vector<16x16xf32>
    %30 = arith.select %27, %25, %29 : vector<16x16xi1>, vector<16x16xf32>
    %c0_26 = arith.constant 0 : index
    %c0_27 = arith.constant 0 : index
    %c0_28 = arith.constant 0 : index
    %31 = vector.load %arg5[%c0_26, %c0_27, %c0_28] : memref<6x16x16xf32, #tpu.memory_space<vmem>>, vector<1x16x16xf32>
    %32 = vector.shape_cast %31 : vector<1x16x16xf32> to vector<16x16xf32>
    %33 = arith.mulf %30, %32 : vector<16x16xf32>
    %34 = arith.truncf %33 : vector<16x16xf32> to vector<16x16xbf16>
    %cst_29 = arith.constant dense<0.000000e+00> : vector<8x16xf32>
    %35 = tpu.matmul %1, %34, %cst_29 {dimension_numbers = #tpu.dot_dimension_numbers<[1], [0], [0], [1], [0, 0, 1, 1], [], []>} : vector<8x16xbf16>, vector<16x16xbf16>, vector<8x16xf32> -> vector<8x16xf32>
    %36 = arith.truncf %35 : vector<8x16xf32> to vector<8x16xbf16>
    %cst_30 = arith.constant dense<0.000000e+00> : vector<8x128xf32>
    %37 = tpu.matmul %36, %4, %cst_30 {dimension_numbers = #tpu.dot_dimension_numbers<[1], [0], [0], [1], [0, 0, 1, 1], [], []>} : vector<8x16xbf16>, vector<16x128xbf16>, vector<8x128xf32> -> vector<8x128xf32>
    %38 = vector.broadcast %6 : vector<1x128xf32> to vector<8x128xf32>
    %39 = arith.addf %37, %38 : vector<8x128xf32>
    %40 = arith.truncf %17 : vector<8x32xf32> to vector<8x32xbf16>
    %cst_31 = arith.constant dense<0.000000e+00> : vector<8x128xf32>
    %41 = tpu.matmul %40, %2, %cst_31 {dimension_numbers = #tpu.dot_dimension_numbers<[1], [0], [0], [1], [0, 0, 1, 1], [], []>} : vector<8x32xbf16>, vector<32x128xbf16>, vector<8x128xf32> -> vector<8x128xf32>
    %42 = arith.addf %39, %41 : vector<8x128xf32>
    %43 = math.tanh %42 : vector<8x128xf32>
    %44 = arith.negf %42 : vector<8x128xf32>
    %45 = math.exp %44 : vector<8x128xf32>
    %cst_32 = arith.constant 1.000000e+00 : f32
    %46 = vector.broadcast %cst_32 : f32 to vector<8x128xf32>
    %47 = arith.addf %46, %45 : vector<8x128xf32>
    %48 = arith.divf %46, %47 : vector<8x128xf32>
    %49 = arith.select %16, %43, %48 : vector<8x128xi1>, vector<8x128xf32>
    %50 = vector.extract_strided_slice %49 {offsets = [0, 0], sizes = [8, 32], strides = [1, 1]} : vector<8x128xf32> to vector<8x32xf32>
    %51 = vector.extract_strided_slice %49 {offsets = [0, 32], sizes = [8, 32], strides = [1, 1]} : vector<8x128xf32> to vector<8x32xf32>
    %52 = vector.extract_strided_slice %49 {offsets = [0, 64], sizes = [8, 32], strides = [1, 1]} : vector<8x128xf32> to vector<8x32xf32>
    %53 = vector.extract_strided_slice %49 {offsets = [0, 96], sizes = [8, 32], strides = [1, 1]} : vector<8x128xf32> to vector<8x32xf32>
    %54 = arith.mulf %51, %18 : vector<8x32xf32>
    %55 = arith.mulf %50, %52 : vector<8x32xf32>
    %56 = arith.addf %54, %55 : vector<8x32xf32>
    %57 = math.tanh %56 : vector<8x32xf32>
    %58 = arith.mulf %53, %57 : vector<8x32xf32>
    %c0_33 = arith.constant 0 : index
    %c0_34 = arith.constant 0 : index
    %c0_35 = arith.constant 0 : index
    %59 = vector.load %arg9[%c0_33, %c0_34, %c0_35] : memref<6x8x32xf32, #tpu.memory_space<vmem>>, vector<1x8x32xf32>
    %60 = vector.shape_cast %59 : vector<1x8x32xf32> to vector<8x32xf32>
    %61 = arith.mulf %58, %60 : vector<8x32xf32>
    %62 = tpu.concatenate %61, %19 in 1 : vector<8x32xf32>, vector<8x32xf32> -> vector<8x64xf32>
    %63 = arith.truncf %62 : vector<8x64xf32> to vector<8x64xbf16>
    %cst_36 = arith.constant dense<0.000000e+00> : vector<8x128xf32>
    %64 = tpu.matmul %63, %3, %cst_36 {dimension_numbers = #tpu.dot_dimension_numbers<[1], [0], [0], [1], [0, 0, 1, 1], [], []>} : vector<8x64xbf16>, vector<64x128xbf16>, vector<8x128xf32> -> vector<8x128xf32>
    %65 = vector.broadcast %7 : vector<1x128xf32> to vector<8x128xf32>
    %66 = arith.addf %64, %65 : vector<8x128xf32>
    %67 = math.tanh %66 : vector<8x128xf32>
    %68 = arith.negf %66 : vector<8x128xf32>
    %69 = math.exp %68 : vector<8x128xf32>
    %cst_37 = arith.constant 1.000000e+00 : f32
    %70 = vector.broadcast %cst_37 : f32 to vector<8x128xf32>
    %71 = arith.addf %70, %69 : vector<8x128xf32>
    %72 = arith.divf %70, %71 : vector<8x128xf32>
    %73 = arith.select %16, %67, %72 : vector<8x128xi1>, vector<8x128xf32>
    %74 = vector.extract_strided_slice %73 {offsets = [0, 0], sizes = [8, 32], strides = [1, 1]} : vector<8x128xf32> to vector<8x32xf32>
    %75 = vector.extract_strided_slice %73 {offsets = [0, 32], sizes = [8, 32], strides = [1, 1]} : vector<8x128xf32> to vector<8x32xf32>
    %76 = vector.extract_strided_slice %73 {offsets = [0, 64], sizes = [8, 32], strides = [1, 1]} : vector<8x128xf32> to vector<8x32xf32>
    %77 = vector.extract_strided_slice %73 {offsets = [0, 96], sizes = [8, 32], strides = [1, 1]} : vector<8x128xf32> to vector<8x32xf32>
    %78 = arith.mulf %75, %20 : vector<8x32xf32>
    %79 = arith.mulf %74, %76 : vector<8x32xf32>
    %80 = arith.addf %78, %79 : vector<8x32xf32>
    %81 = math.tanh %80 : vector<8x32xf32>
    %82 = arith.mulf %77, %81 : vector<8x32xf32>
    %83 = vector.extract_strided_slice %10 {offsets = [16, 0], sizes = [16, 16], strides = [1, 1]} : vector<96x16xf32> to vector<16x16xf32>
    %84 = arith.truncf %83 : vector<16x16xf32> to vector<16x16xbf16>
    %cst_38 = arith.constant dense<0.000000e+00> : vector<16x16xf32>
    %85 = tpu.matmul %0, %84, %cst_38 {dimension_numbers = #tpu.dot_dimension_numbers<[1], [0], [0], [1], [0, 0, 1, 1], [], []>} : vector<16x16xbf16>, vector<16x16xbf16>, vector<16x16xf32> -> vector<16x16xf32>
    %86 = vector.broadcast %5 : vector<1x16xf32> to vector<16x16xf32>
    %87 = arith.addf %85, %86 : vector<16x16xf32>
    %cst_39 = arith.constant 0.000000e+00 : f32
    %88 = vector.broadcast %cst_39 : f32 to vector<16x16xf32>
    %89 = arith.cmpf oge, %87, %88 : vector<16x16xf32>
    %cst_40 = arith.constant 0.00999999977 : f32
    %90 = vector.broadcast %cst_40 : f32 to vector<16x16xf32>
    %91 = arith.mulf %90, %87 : vector<16x16xf32>
    %92 = arith.select %89, %87, %91 : vector<16x16xi1>, vector<16x16xf32>
    %c1 = arith.constant 1 : index
    %c0_41 = arith.constant 0 : index
    %c0_42 = arith.constant 0 : index
    %93 = vector.load %arg5[%c1, %c0_41, %c0_42] : memref<6x16x16xf32, #tpu.memory_space<vmem>>, vector<1x16x16xf32>
    %94 = vector.shape_cast %93 : vector<1x16x16xf32> to vector<16x16xf32>
    %95 = arith.mulf %92, %94 : vector<16x16xf32>
    %96 = arith.truncf %95 : vector<16x16xf32> to vector<16x16xbf16>
    %cst_43 = arith.constant dense<0.000000e+00> : vector<8x16xf32>
    %97 = tpu.matmul %1, %96, %cst_43 {dimension_numbers = #tpu.dot_dimension_numbers<[1], [0], [0], [1], [0, 0, 1, 1], [], []>} : vector<8x16xbf16>, vector<16x16xbf16>, vector<8x16xf32> -> vector<8x16xf32>
    %98 = arith.truncf %97 : vector<8x16xf32> to vector<8x16xbf16>
    %cst_44 = arith.constant dense<0.000000e+00> : vector<8x128xf32>
    %99 = tpu.matmul %98, %4, %cst_44 {dimension_numbers = #tpu.dot_dimension_numbers<[1], [0], [0], [1], [0, 0, 1, 1], [], []>} : vector<8x16xbf16>, vector<16x128xbf16>, vector<8x128xf32> -> vector<8x128xf32>
    %100 = vector.broadcast %6 : vector<1x128xf32> to vector<8x128xf32>
    %101 = arith.addf %99, %100 : vector<8x128xf32>
    %102 = arith.truncf %58 : vector<8x32xf32> to vector<8x32xbf16>
    %cst_45 = arith.constant dense<0.000000e+00> : vector<8x128xf32>
    %103 = tpu.matmul %102, %2, %cst_45 {dimension_numbers = #tpu.dot_dimension_numbers<[1], [0], [0], [1], [0, 0, 1, 1], [], []>} : vector<8x32xbf16>, vector<32x128xbf16>, vector<8x128xf32> -> vector<8x128xf32>
    %104 = arith.addf %101, %103 : vector<8x128xf32>
    %105 = math.tanh %104 : vector<8x128xf32>
    %106 = arith.negf %104 : vector<8x128xf32>
    %107 = math.exp %106 : vector<8x128xf32>
    %cst_46 = arith.constant 1.000000e+00 : f32
    %108 = vector.broadcast %cst_46 : f32 to vector<8x128xf32>
    %109 = arith.addf %108, %107 : vector<8x128xf32>
    %110 = arith.divf %108, %109 : vector<8x128xf32>
    %111 = arith.select %16, %105, %110 : vector<8x128xi1>, vector<8x128xf32>
    %112 = vector.extract_strided_slice %111 {offsets = [0, 0], sizes = [8, 32], strides = [1, 1]} : vector<8x128xf32> to vector<8x32xf32>
    %113 = vector.extract_strided_slice %111 {offsets = [0, 32], sizes = [8, 32], strides = [1, 1]} : vector<8x128xf32> to vector<8x32xf32>
    %114 = vector.extract_strided_slice %111 {offsets = [0, 64], sizes = [8, 32], strides = [1, 1]} : vector<8x128xf32> to vector<8x32xf32>
    %115 = vector.extract_strided_slice %111 {offsets = [0, 96], sizes = [8, 32], strides = [1, 1]} : vector<8x128xf32> to vector<8x32xf32>
    %116 = arith.mulf %113, %56 : vector<8x32xf32>
    %117 = arith.mulf %112, %114 : vector<8x32xf32>
    %118 = arith.addf %116, %117 : vector<8x32xf32>
    %119 = math.tanh %118 : vector<8x32xf32>
    %120 = arith.mulf %115, %119 : vector<8x32xf32>
    %c1_47 = arith.constant 1 : index
    %c0_48 = arith.constant 0 : index
    %c0_49 = arith.constant 0 : index
    %121 = vector.load %arg9[%c1_47, %c0_48, %c0_49] : memref<6x8x32xf32, #tpu.memory_space<vmem>>, vector<1x8x32xf32>
    %122 = vector.shape_cast %121 : vector<1x8x32xf32> to vector<8x32xf32>
    %123 = arith.mulf %120, %122 : vector<8x32xf32>
    %124 = tpu.concatenate %123, %82 in 1 : vector<8x32xf32>, vector<8x32xf32> -> vector<8x64xf32>
    %125 = arith.truncf %124 : vector<8x64xf32> to vector<8x64xbf16>
    %cst_50 = arith.constant dense<0.000000e+00> : vector<8x128xf32>
    %126 = tpu.matmul %125, %3, %cst_50 {dimension_numbers = #tpu.dot_dimension_numbers<[1], [0], [0], [1], [0, 0, 1, 1], [], []>} : vector<8x64xbf16>, vector<64x128xbf16>, vector<8x128xf32> -> vector<8x128xf32>
    %127 = vector.broadcast %7 : vector<1x128xf32> to vector<8x128xf32>
    %128 = arith.addf %126, %127 : vector<8x128xf32>
    %129 = math.tanh %128 : vector<8x128xf32>
    %130 = arith.negf %128 : vector<8x128xf32>
    %131 = math.exp %130 : vector<8x128xf32>
    %cst_51 = arith.constant 1.000000e+00 : f32
    %132 = vector.broadcast %cst_51 : f32 to vector<8x128xf32>
    %133 = arith.addf %132, %131 : vector<8x128xf32>
    %134 = arith.divf %132, %133 : vector<8x128xf32>
    %135 = arith.select %16, %129, %134 : vector<8x128xi1>, vector<8x128xf32>
    %136 = vector.extract_strided_slice %135 {offsets = [0, 0], sizes = [8, 32], strides = [1, 1]} : vector<8x128xf32> to vector<8x32xf32>
    %137 = vector.extract_strided_slice %135 {offsets = [0, 32], sizes = [8, 32], strides = [1, 1]} : vector<8x128xf32> to vector<8x32xf32>
    %138 = vector.extract_strided_slice %135 {offsets = [0, 64], sizes = [8, 32], strides = [1, 1]} : vector<8x128xf32> to vector<8x32xf32>
    %139 = vector.extract_strided_slice %135 {offsets = [0, 96], sizes = [8, 32], strides = [1, 1]} : vector<8x128xf32> to vector<8x32xf32>
    %140 = arith.mulf %137, %80 : vector<8x32xf32>
    %141 = arith.mulf %136, %138 : vector<8x32xf32>
    %142 = arith.addf %140, %141 : vector<8x32xf32>
    %143 = math.tanh %142 : vector<8x32xf32>
    %144 = arith.mulf %139, %143 : vector<8x32xf32>
    %145 = vector.extract_strided_slice %10 {offsets = [32, 0], sizes = [16, 16], strides = [1, 1]} : vector<96x16xf32> to vector<16x16xf32>
    %146 = arith.truncf %145 : vector<16x16xf32> to vector<16x16xbf16>
    %cst_52 = arith.constant dense<0.000000e+00> : vector<16x16xf32>
    %147 = tpu.matmul %0, %146, %cst_52 {dimension_numbers = #tpu.dot_dimension_numbers<[1], [0], [0], [1], [0, 0, 1, 1], [], []>} : vector<16x16xbf16>, vector<16x16xbf16>, vector<16x16xf32> -> vector<16x16xf32>
    %148 = vector.broadcast %5 : vector<1x16xf32> to vector<16x16xf32>
    %149 = arith.addf %147, %148 : vector<16x16xf32>
    %cst_53 = arith.constant 0.000000e+00 : f32
    %150 = vector.broadcast %cst_53 : f32 to vector<16x16xf32>
    %151 = arith.cmpf oge, %149, %150 : vector<16x16xf32>
    %cst_54 = arith.constant 0.00999999977 : f32
    %152 = vector.broadcast %cst_54 : f32 to vector<16x16xf32>
    %153 = arith.mulf %152, %149 : vector<16x16xf32>
    %154 = arith.select %151, %149, %153 : vector<16x16xi1>, vector<16x16xf32>
    %c2 = arith.constant 2 : index
    %c0_55 = arith.constant 0 : index
    %c0_56 = arith.constant 0 : index
    %155 = vector.load %arg5[%c2, %c0_55, %c0_56] : memref<6x16x16xf32, #tpu.memory_space<vmem>>, vector<1x16x16xf32>
    %156 = vector.shape_cast %155 : vector<1x16x16xf32> to vector<16x16xf32>
    %157 = arith.mulf %154, %156 : vector<16x16xf32>
    %158 = arith.truncf %157 : vector<16x16xf32> to vector<16x16xbf16>
    %cst_57 = arith.constant dense<0.000000e+00> : vector<8x16xf32>
    %159 = tpu.matmul %1, %158, %cst_57 {dimension_numbers = #tpu.dot_dimension_numbers<[1], [0], [0], [1], [0, 0, 1, 1], [], []>} : vector<8x16xbf16>, vector<16x16xbf16>, vector<8x16xf32> -> vector<8x16xf32>
    %160 = arith.truncf %159 : vector<8x16xf32> to vector<8x16xbf16>
    %cst_58 = arith.constant dense<0.000000e+00> : vector<8x128xf32>
    %161 = tpu.matmul %160, %4, %cst_58 {dimension_numbers = #tpu.dot_dimension_numbers<[1], [0], [0], [1], [0, 0, 1, 1], [], []>} : vector<8x16xbf16>, vector<16x128xbf16>, vector<8x128xf32> -> vector<8x128xf32>
    %162 = vector.broadcast %6 : vector<1x128xf32> to vector<8x128xf32>
    %163 = arith.addf %161, %162 : vector<8x128xf32>
    %164 = arith.truncf %120 : vector<8x32xf32> to vector<8x32xbf16>
    %cst_59 = arith.constant dense<0.000000e+00> : vector<8x128xf32>
    %165 = tpu.matmul %164, %2, %cst_59 {dimension_numbers = #tpu.dot_dimension_numbers<[1], [0], [0], [1], [0, 0, 1, 1], [], []>} : vector<8x32xbf16>, vector<32x128xbf16>, vector<8x128xf32> -> vector<8x128xf32>
    %166 = arith.addf %163, %165 : vector<8x128xf32>
    %167 = math.tanh %166 : vector<8x128xf32>
    %168 = arith.negf %166 : vector<8x128xf32>
    %169 = math.exp %168 : vector<8x128xf32>
    %cst_60 = arith.constant 1.000000e+00 : f32
    %170 = vector.broadcast %cst_60 : f32 to vector<8x128xf32>
    %171 = arith.addf %170, %169 : vector<8x128xf32>
    %172 = arith.divf %170, %171 : vector<8x128xf32>
    %173 = arith.select %16, %167, %172 : vector<8x128xi1>, vector<8x128xf32>
    %174 = vector.extract_strided_slice %173 {offsets = [0, 0], sizes = [8, 32], strides = [1, 1]} : vector<8x128xf32> to vector<8x32xf32>
    %175 = vector.extract_strided_slice %173 {offsets = [0, 32], sizes = [8, 32], strides = [1, 1]} : vector<8x128xf32> to vector<8x32xf32>
    %176 = vector.extract_strided_slice %173 {offsets = [0, 64], sizes = [8, 32], strides = [1, 1]} : vector<8x128xf32> to vector<8x32xf32>
    %177 = vector.extract_strided_slice %173 {offsets = [0, 96], sizes = [8, 32], strides = [1, 1]} : vector<8x128xf32> to vector<8x32xf32>
    %178 = arith.mulf %175, %118 : vector<8x32xf32>
    %179 = arith.mulf %174, %176 : vector<8x32xf32>
    %180 = arith.addf %178, %179 : vector<8x32xf32>
    %181 = math.tanh %180 : vector<8x32xf32>
    %182 = arith.mulf %177, %181 : vector<8x32xf32>
    %c2_61 = arith.constant 2 : index
    %c0_62 = arith.constant 0 : index
    %c0_63 = arith.constant 0 : index
    %183 = vector.load %arg9[%c2_61, %c0_62, %c0_63] : memref<6x8x32xf32, #tpu.memory_space<vmem>>, vector<1x8x32xf32>
    %184 = vector.shape_cast %183 : vector<1x8x32xf32> to vector<8x32xf32>
    %185 = arith.mulf %182, %184 : vector<8x32xf32>
    %186 = tpu.concatenate %185, %144 in 1 : vector<8x32xf32>, vector<8x32xf32> -> vector<8x64xf32>
    %187 = arith.truncf %186 : vector<8x64xf32> to vector<8x64xbf16>
    %cst_64 = arith.constant dense<0.000000e+00> : vector<8x128xf32>
    %188 = tpu.matmul %187, %3, %cst_64 {dimension_numbers = #tpu.dot_dimension_numbers<[1], [0], [0], [1], [0, 0, 1, 1], [], []>} : vector<8x64xbf16>, vector<64x128xbf16>, vector<8x128xf32> -> vector<8x128xf32>
    %189 = vector.broadcast %7 : vector<1x128xf32> to vector<8x128xf32>
    %190 = arith.addf %188, %189 : vector<8x128xf32>
    %191 = math.tanh %190 : vector<8x128xf32>
    %192 = arith.negf %190 : vector<8x128xf32>
    %193 = math.exp %192 : vector<8x128xf32>
    %cst_65 = arith.constant 1.000000e+00 : f32
    %194 = vector.broadcast %cst_65 : f32 to vector<8x128xf32>
    %195 = arith.addf %194, %193 : vector<8x128xf32>
    %196 = arith.divf %194, %195 : vector<8x128xf32>
    %197 = arith.select %16, %191, %196 : vector<8x128xi1>, vector<8x128xf32>
    %198 = vector.extract_strided_slice %197 {offsets = [0, 0], sizes = [8, 32], strides = [1, 1]} : vector<8x128xf32> to vector<8x32xf32>
    %199 = vector.extract_strided_slice %197 {offsets = [0, 32], sizes = [8, 32], strides = [1, 1]} : vector<8x128xf32> to vector<8x32xf32>
    %200 = vector.extract_strided_slice %197 {offsets = [0, 64], sizes = [8, 32], strides = [1, 1]} : vector<8x128xf32> to vector<8x32xf32>
    %201 = vector.extract_strided_slice %197 {offsets = [0, 96], sizes = [8, 32], strides = [1, 1]} : vector<8x128xf32> to vector<8x32xf32>
    %202 = arith.mulf %199, %142 : vector<8x32xf32>
    %203 = arith.mulf %198, %200 : vector<8x32xf32>
    %204 = arith.addf %202, %203 : vector<8x32xf32>
    %205 = math.tanh %204 : vector<8x32xf32>
    %206 = arith.mulf %201, %205 : vector<8x32xf32>
    %207 = vector.extract_strided_slice %10 {offsets = [48, 0], sizes = [16, 16], strides = [1, 1]} : vector<96x16xf32> to vector<16x16xf32>
    %208 = arith.truncf %207 : vector<16x16xf32> to vector<16x16xbf16>
    %cst_66 = arith.constant dense<0.000000e+00> : vector<16x16xf32>
    %209 = tpu.matmul %0, %208, %cst_66 {dimension_numbers = #tpu.dot_dimension_numbers<[1], [0], [0], [1], [0, 0, 1, 1], [], []>} : vector<16x16xbf16>, vector<16x16xbf16>, vector<16x16xf32> -> vector<16x16xf32>
    %210 = vector.broadcast %5 : vector<1x16xf32> to vector<16x16xf32>
    %211 = arith.addf %209, %210 : vector<16x16xf32>
    %cst_67 = arith.constant 0.000000e+00 : f32
    %212 = vector.broadcast %cst_67 : f32 to vector<16x16xf32>
    %213 = arith.cmpf oge, %211, %212 : vector<16x16xf32>
    %cst_68 = arith.constant 0.00999999977 : f32
    %214 = vector.broadcast %cst_68 : f32 to vector<16x16xf32>
    %215 = arith.mulf %214, %211 : vector<16x16xf32>
    %216 = arith.select %213, %211, %215 : vector<16x16xi1>, vector<16x16xf32>
    %c3 = arith.constant 3 : index
    %c0_69 = arith.constant 0 : index
    %c0_70 = arith.constant 0 : index
    %217 = vector.load %arg5[%c3, %c0_69, %c0_70] : memref<6x16x16xf32, #tpu.memory_space<vmem>>, vector<1x16x16xf32>
    %218 = vector.shape_cast %217 : vector<1x16x16xf32> to vector<16x16xf32>
    %219 = arith.mulf %216, %218 : vector<16x16xf32>
    %220 = arith.truncf %219 : vector<16x16xf32> to vector<16x16xbf16>
    %cst_71 = arith.constant dense<0.000000e+00> : vector<8x16xf32>
    %221 = tpu.matmul %1, %220, %cst_71 {dimension_numbers = #tpu.dot_dimension_numbers<[1], [0], [0], [1], [0, 0, 1, 1], [], []>} : vector<8x16xbf16>, vector<16x16xbf16>, vector<8x16xf32> -> vector<8x16xf32>
    %222 = arith.truncf %221 : vector<8x16xf32> to vector<8x16xbf16>
    %cst_72 = arith.constant dense<0.000000e+00> : vector<8x128xf32>
    %223 = tpu.matmul %222, %4, %cst_72 {dimension_numbers = #tpu.dot_dimension_numbers<[1], [0], [0], [1], [0, 0, 1, 1], [], []>} : vector<8x16xbf16>, vector<16x128xbf16>, vector<8x128xf32> -> vector<8x128xf32>
    %224 = vector.broadcast %6 : vector<1x128xf32> to vector<8x128xf32>
    %225 = arith.addf %223, %224 : vector<8x128xf32>
    %226 = arith.truncf %182 : vector<8x32xf32> to vector<8x32xbf16>
    %cst_73 = arith.constant dense<0.000000e+00> : vector<8x128xf32>
    %227 = tpu.matmul %226, %2, %cst_73 {dimension_numbers = #tpu.dot_dimension_numbers<[1], [0], [0], [1], [0, 0, 1, 1], [], []>} : vector<8x32xbf16>, vector<32x128xbf16>, vector<8x128xf32> -> vector<8x128xf32>
    %228 = arith.addf %225, %227 : vector<8x128xf32>
    %229 = math.tanh %228 : vector<8x128xf32>
    %230 = arith.negf %228 : vector<8x128xf32>
    %231 = math.exp %230 : vector<8x128xf32>
    %cst_74 = arith.constant 1.000000e+00 : f32
    %232 = vector.broadcast %cst_74 : f32 to vector<8x128xf32>
    %233 = arith.addf %232, %231 : vector<8x128xf32>
    %234 = arith.divf %232, %233 : vector<8x128xf32>
    %235 = arith.select %16, %229, %234 : vector<8x128xi1>, vector<8x128xf32>
    %236 = vector.extract_strided_slice %235 {offsets = [0, 0], sizes = [8, 32], strides = [1, 1]} : vector<8x128xf32> to vector<8x32xf32>
    %237 = vector.extract_strided_slice %235 {offsets = [0, 32], sizes = [8, 32], strides = [1, 1]} : vector<8x128xf32> to vector<8x32xf32>
    %238 = vector.extract_strided_slice %235 {offsets = [0, 64], sizes = [8, 32], strides = [1, 1]} : vector<8x128xf32> to vector<8x32xf32>
    %239 = vector.extract_strided_slice %235 {offsets = [0, 96], sizes = [8, 32], strides = [1, 1]} : vector<8x128xf32> to vector<8x32xf32>
    %240 = arith.mulf %237, %180 : vector<8x32xf32>
    %241 = arith.mulf %236, %238 : vector<8x32xf32>
    %242 = arith.addf %240, %241 : vector<8x32xf32>
    %243 = math.tanh %242 : vector<8x32xf32>
    %244 = arith.mulf %239, %243 : vector<8x32xf32>
    %c3_75 = arith.constant 3 : index
    %c0_76 = arith.constant 0 : index
    %c0_77 = arith.constant 0 : index
    %245 = vector.load %arg9[%c3_75, %c0_76, %c0_77] : memref<6x8x32xf32, #tpu.memory_space<vmem>>, vector<1x8x32xf32>
    %246 = vector.shape_cast %245 : vector<1x8x32xf32> to vector<8x32xf32>
    %247 = arith.mulf %244, %246 : vector<8x32xf32>
    %248 = tpu.concatenate %247, %206 in 1 : vector<8x32xf32>, vector<8x32xf32> -> vector<8x64xf32>
    %249 = arith.truncf %248 : vector<8x64xf32> to vector<8x64xbf16>
    %cst_78 = arith.constant dense<0.000000e+00> : vector<8x128xf32>
    %250 = tpu.matmul %249, %3, %cst_78 {dimension_numbers = #tpu.dot_dimension_numbers<[1], [0], [0], [1], [0, 0, 1, 1], [], []>} : vector<8x64xbf16>, vector<64x128xbf16>, vector<8x128xf32> -> vector<8x128xf32>
    %251 = vector.broadcast %7 : vector<1x128xf32> to vector<8x128xf32>
    %252 = arith.addf %250, %251 : vector<8x128xf32>
    %253 = math.tanh %252 : vector<8x128xf32>
    %254 = arith.negf %252 : vector<8x128xf32>
    %255 = math.exp %254 : vector<8x128xf32>
    %cst_79 = arith.constant 1.000000e+00 : f32
    %256 = vector.broadcast %cst_79 : f32 to vector<8x128xf32>
    %257 = arith.addf %256, %255 : vector<8x128xf32>
    %258 = arith.divf %256, %257 : vector<8x128xf32>
    %259 = arith.select %16, %253, %258 : vector<8x128xi1>, vector<8x128xf32>
    %260 = vector.extract_strided_slice %259 {offsets = [0, 0], sizes = [8, 32], strides = [1, 1]} : vector<8x128xf32> to vector<8x32xf32>
    %261 = vector.extract_strided_slice %259 {offsets = [0, 32], sizes = [8, 32], strides = [1, 1]} : vector<8x128xf32> to vector<8x32xf32>
    %262 = vector.extract_strided_slice %259 {offsets = [0, 64], sizes = [8, 32], strides = [1, 1]} : vector<8x128xf32> to vector<8x32xf32>
    %263 = vector.extract_strided_slice %259 {offsets = [0, 96], sizes = [8, 32], strides = [1, 1]} : vector<8x128xf32> to vector<8x32xf32>
    %264 = arith.mulf %261, %204 : vector<8x32xf32>
    %265 = arith.mulf %260, %262 : vector<8x32xf32>
    %266 = arith.addf %264, %265 : vector<8x32xf32>
    %267 = math.tanh %266 : vector<8x32xf32>
    %268 = arith.mulf %263, %267 : vector<8x32xf32>
    %269 = vector.extract_strided_slice %10 {offsets = [64, 0], sizes = [16, 16], strides = [1, 1]} : vector<96x16xf32> to vector<16x16xf32>
    %270 = arith.truncf %269 : vector<16x16xf32> to vector<16x16xbf16>
    %cst_80 = arith.constant dense<0.000000e+00> : vector<16x16xf32>
    %271 = tpu.matmul %0, %270, %cst_80 {dimension_numbers = #tpu.dot_dimension_numbers<[1], [0], [0], [1], [0, 0, 1, 1], [], []>} : vector<16x16xbf16>, vector<16x16xbf16>, vector<16x16xf32> -> vector<16x16xf32>
    %272 = vector.broadcast %5 : vector<1x16xf32> to vector<16x16xf32>
    %273 = arith.addf %271, %272 : vector<16x16xf32>
    %cst_81 = arith.constant 0.000000e+00 : f32
    %274 = vector.broadcast %cst_81 : f32 to vector<16x16xf32>
    %275 = arith.cmpf oge, %273, %274 : vector<16x16xf32>
    %cst_82 = arith.constant 0.00999999977 : f32
    %276 = vector.broadcast %cst_82 : f32 to vector<16x16xf32>
    %277 = arith.mulf %276, %273 : vector<16x16xf32>
    %278 = arith.select %275, %273, %277 : vector<16x16xi1>, vector<16x16xf32>
    %c4 = arith.constant 4 : index
    %c0_83 = arith.constant 0 : index
    %c0_84 = arith.constant 0 : index
    %279 = vector.load %arg5[%c4, %c0_83, %c0_84] : memref<6x16x16xf32, #tpu.memory_space<vmem>>, vector<1x16x16xf32>
    %280 = vector.shape_cast %279 : vector<1x16x16xf32> to vector<16x16xf32>
    %281 = arith.mulf %278, %280 : vector<16x16xf32>
    %282 = arith.truncf %281 : vector<16x16xf32> to vector<16x16xbf16>
    %cst_85 = arith.constant dense<0.000000e+00> : vector<8x16xf32>
    %283 = tpu.matmul %1, %282, %cst_85 {dimension_numbers = #tpu.dot_dimension_numbers<[1], [0], [0], [1], [0, 0, 1, 1], [], []>} : vector<8x16xbf16>, vector<16x16xbf16>, vector<8x16xf32> -> vector<8x16xf32>
    %284 = arith.truncf %283 : vector<8x16xf32> to vector<8x16xbf16>
    %cst_86 = arith.constant dense<0.000000e+00> : vector<8x128xf32>
    %285 = tpu.matmul %284, %4, %cst_86 {dimension_numbers = #tpu.dot_dimension_numbers<[1], [0], [0], [1], [0, 0, 1, 1], [], []>} : vector<8x16xbf16>, vector<16x128xbf16>, vector<8x128xf32> -> vector<8x128xf32>
    %286 = vector.broadcast %6 : vector<1x128xf32> to vector<8x128xf32>
    %287 = arith.addf %285, %286 : vector<8x128xf32>
    %288 = arith.truncf %244 : vector<8x32xf32> to vector<8x32xbf16>
    %cst_87 = arith.constant dense<0.000000e+00> : vector<8x128xf32>
    %289 = tpu.matmul %288, %2, %cst_87 {dimension_numbers = #tpu.dot_dimension_numbers<[1], [0], [0], [1], [0, 0, 1, 1], [], []>} : vector<8x32xbf16>, vector<32x128xbf16>, vector<8x128xf32> -> vector<8x128xf32>
    %290 = arith.addf %287, %289 : vector<8x128xf32>
    %291 = math.tanh %290 : vector<8x128xf32>
    %292 = arith.negf %290 : vector<8x128xf32>
    %293 = math.exp %292 : vector<8x128xf32>
    %cst_88 = arith.constant 1.000000e+00 : f32
    %294 = vector.broadcast %cst_88 : f32 to vector<8x128xf32>
    %295 = arith.addf %294, %293 : vector<8x128xf32>
    %296 = arith.divf %294, %295 : vector<8x128xf32>
    %297 = arith.select %16, %291, %296 : vector<8x128xi1>, vector<8x128xf32>
    %298 = vector.extract_strided_slice %297 {offsets = [0, 0], sizes = [8, 32], strides = [1, 1]} : vector<8x128xf32> to vector<8x32xf32>
    %299 = vector.extract_strided_slice %297 {offsets = [0, 32], sizes = [8, 32], strides = [1, 1]} : vector<8x128xf32> to vector<8x32xf32>
    %300 = vector.extract_strided_slice %297 {offsets = [0, 64], sizes = [8, 32], strides = [1, 1]} : vector<8x128xf32> to vector<8x32xf32>
    %301 = vector.extract_strided_slice %297 {offsets = [0, 96], sizes = [8, 32], strides = [1, 1]} : vector<8x128xf32> to vector<8x32xf32>
    %302 = arith.mulf %299, %242 : vector<8x32xf32>
    %303 = arith.mulf %298, %300 : vector<8x32xf32>
    %304 = arith.addf %302, %303 : vector<8x32xf32>
    %305 = math.tanh %304 : vector<8x32xf32>
    %306 = arith.mulf %301, %305 : vector<8x32xf32>
    %c4_89 = arith.constant 4 : index
    %c0_90 = arith.constant 0 : index
    %c0_91 = arith.constant 0 : index
    %307 = vector.load %arg9[%c4_89, %c0_90, %c0_91] : memref<6x8x32xf32, #tpu.memory_space<vmem>>, vector<1x8x32xf32>
    %308 = vector.shape_cast %307 : vector<1x8x32xf32> to vector<8x32xf32>
    %309 = arith.mulf %306, %308 : vector<8x32xf32>
    %310 = tpu.concatenate %309, %268 in 1 : vector<8x32xf32>, vector<8x32xf32> -> vector<8x64xf32>
    %311 = arith.truncf %310 : vector<8x64xf32> to vector<8x64xbf16>
    %cst_92 = arith.constant dense<0.000000e+00> : vector<8x128xf32>
    %312 = tpu.matmul %311, %3, %cst_92 {dimension_numbers = #tpu.dot_dimension_numbers<[1], [0], [0], [1], [0, 0, 1, 1], [], []>} : vector<8x64xbf16>, vector<64x128xbf16>, vector<8x128xf32> -> vector<8x128xf32>
    %313 = vector.broadcast %7 : vector<1x128xf32> to vector<8x128xf32>
    %314 = arith.addf %312, %313 : vector<8x128xf32>
    %315 = math.tanh %314 : vector<8x128xf32>
    %316 = arith.negf %314 : vector<8x128xf32>
    %317 = math.exp %316 : vector<8x128xf32>
    %cst_93 = arith.constant 1.000000e+00 : f32
    %318 = vector.broadcast %cst_93 : f32 to vector<8x128xf32>
    %319 = arith.addf %318, %317 : vector<8x128xf32>
    %320 = arith.divf %318, %319 : vector<8x128xf32>
    %321 = arith.select %16, %315, %320 : vector<8x128xi1>, vector<8x128xf32>
    %322 = vector.extract_strided_slice %321 {offsets = [0, 0], sizes = [8, 32], strides = [1, 1]} : vector<8x128xf32> to vector<8x32xf32>
    %323 = vector.extract_strided_slice %321 {offsets = [0, 32], sizes = [8, 32], strides = [1, 1]} : vector<8x128xf32> to vector<8x32xf32>
    %324 = vector.extract_strided_slice %321 {offsets = [0, 64], sizes = [8, 32], strides = [1, 1]} : vector<8x128xf32> to vector<8x32xf32>
    %325 = vector.extract_strided_slice %321 {offsets = [0, 96], sizes = [8, 32], strides = [1, 1]} : vector<8x128xf32> to vector<8x32xf32>
    %326 = arith.mulf %323, %266 : vector<8x32xf32>
    %327 = arith.mulf %322, %324 : vector<8x32xf32>
    %328 = arith.addf %326, %327 : vector<8x32xf32>
    %329 = math.tanh %328 : vector<8x32xf32>
    %330 = arith.mulf %325, %329 : vector<8x32xf32>
    %331 = vector.extract_strided_slice %10 {offsets = [80, 0], sizes = [16, 16], strides = [1, 1]} : vector<96x16xf32> to vector<16x16xf32>
    %332 = arith.truncf %331 : vector<16x16xf32> to vector<16x16xbf16>
    %cst_94 = arith.constant dense<0.000000e+00> : vector<16x16xf32>
    %333 = tpu.matmul %0, %332, %cst_94 {dimension_numbers = #tpu.dot_dimension_numbers<[1], [0], [0], [1], [0, 0, 1, 1], [], []>} : vector<16x16xbf16>, vector<16x16xbf16>, vector<16x16xf32> -> vector<16x16xf32>
    %334 = vector.broadcast %5 : vector<1x16xf32> to vector<16x16xf32>
    %335 = arith.addf %333, %334 : vector<16x16xf32>
    %cst_95 = arith.constant 0.000000e+00 : f32
    %336 = vector.broadcast %cst_95 : f32 to vector<16x16xf32>
    %337 = arith.cmpf oge, %335, %336 : vector<16x16xf32>
    %cst_96 = arith.constant 0.00999999977 : f32
    %338 = vector.broadcast %cst_96 : f32 to vector<16x16xf32>
    %339 = arith.mulf %338, %335 : vector<16x16xf32>
    %340 = arith.select %337, %335, %339 : vector<16x16xi1>, vector<16x16xf32>
    %c5 = arith.constant 5 : index
    %c0_97 = arith.constant 0 : index
    %c0_98 = arith.constant 0 : index
    %341 = vector.load %arg5[%c5, %c0_97, %c0_98] : memref<6x16x16xf32, #tpu.memory_space<vmem>>, vector<1x16x16xf32>
    %342 = vector.shape_cast %341 : vector<1x16x16xf32> to vector<16x16xf32>
    %343 = arith.mulf %340, %342 : vector<16x16xf32>
    %344 = arith.truncf %343 : vector<16x16xf32> to vector<16x16xbf16>
    %cst_99 = arith.constant dense<0.000000e+00> : vector<8x16xf32>
    %345 = tpu.matmul %1, %344, %cst_99 {dimension_numbers = #tpu.dot_dimension_numbers<[1], [0], [0], [1], [0, 0, 1, 1], [], []>} : vector<8x16xbf16>, vector<16x16xbf16>, vector<8x16xf32> -> vector<8x16xf32>
    %346 = arith.truncf %345 : vector<8x16xf32> to vector<8x16xbf16>
    %cst_100 = arith.constant dense<0.000000e+00> : vector<8x128xf32>
    %347 = tpu.matmul %346, %4, %cst_100 {dimension_numbers = #tpu.dot_dimension_numbers<[1], [0], [0], [1], [0, 0, 1, 1], [], []>} : vector<8x16xbf16>, vector<16x128xbf16>, vector<8x128xf32> -> vector<8x128xf32>
    %348 = vector.broadcast %6 : vector<1x128xf32> to vector<8x128xf32>
    %349 = arith.addf %347, %348 : vector<8x128xf32>
    %350 = arith.truncf %306 : vector<8x32xf32> to vector<8x32xbf16>
    %cst_101 = arith.constant dense<0.000000e+00> : vector<8x128xf32>
    %351 = tpu.matmul %350, %2, %cst_101 {dimension_numbers = #tpu.dot_dimension_numbers<[1], [0], [0], [1], [0, 0, 1, 1], [], []>} : vector<8x32xbf16>, vector<32x128xbf16>, vector<8x128xf32> -> vector<8x128xf32>
    %352 = arith.addf %349, %351 : vector<8x128xf32>
    %353 = math.tanh %352 : vector<8x128xf32>
    %354 = arith.negf %352 : vector<8x128xf32>
    %355 = math.exp %354 : vector<8x128xf32>
    %cst_102 = arith.constant 1.000000e+00 : f32
    %356 = vector.broadcast %cst_102 : f32 to vector<8x128xf32>
    %357 = arith.addf %356, %355 : vector<8x128xf32>
    %358 = arith.divf %356, %357 : vector<8x128xf32>
    %359 = arith.select %16, %353, %358 : vector<8x128xi1>, vector<8x128xf32>
    %360 = vector.extract_strided_slice %359 {offsets = [0, 0], sizes = [8, 32], strides = [1, 1]} : vector<8x128xf32> to vector<8x32xf32>
    %361 = vector.extract_strided_slice %359 {offsets = [0, 32], sizes = [8, 32], strides = [1, 1]} : vector<8x128xf32> to vector<8x32xf32>
    %362 = vector.extract_strided_slice %359 {offsets = [0, 64], sizes = [8, 32], strides = [1, 1]} : vector<8x128xf32> to vector<8x32xf32>
    %363 = vector.extract_strided_slice %359 {offsets = [0, 96], sizes = [8, 32], strides = [1, 1]} : vector<8x128xf32> to vector<8x32xf32>
    %364 = arith.mulf %361, %304 : vector<8x32xf32>
    %365 = arith.mulf %360, %362 : vector<8x32xf32>
    %366 = arith.addf %364, %365 : vector<8x32xf32>
    %367 = math.tanh %366 : vector<8x32xf32>
    %368 = arith.mulf %363, %367 : vector<8x32xf32>
    %c5_103 = arith.constant 5 : index
    %c0_104 = arith.constant 0 : index
    %c0_105 = arith.constant 0 : index
    %369 = vector.load %arg9[%c5_103, %c0_104, %c0_105] : memref<6x8x32xf32, #tpu.memory_space<vmem>>, vector<1x8x32xf32>
    %370 = vector.shape_cast %369 : vector<1x8x32xf32> to vector<8x32xf32>
    %371 = arith.mulf %368, %370 : vector<8x32xf32>
    %372 = tpu.concatenate %371, %330 in 1 : vector<8x32xf32>, vector<8x32xf32> -> vector<8x64xf32>
    %373 = arith.truncf %372 : vector<8x64xf32> to vector<8x64xbf16>
    %cst_106 = arith.constant dense<0.000000e+00> : vector<8x128xf32>
    %374 = tpu.matmul %373, %3, %cst_106 {dimension_numbers = #tpu.dot_dimension_numbers<[1], [0], [0], [1], [0, 0, 1, 1], [], []>} : vector<8x64xbf16>, vector<64x128xbf16>, vector<8x128xf32> -> vector<8x128xf32>
    %375 = vector.broadcast %7 : vector<1x128xf32> to vector<8x128xf32>
    %376 = arith.addf %374, %375 : vector<8x128xf32>
    %377 = math.tanh %376 : vector<8x128xf32>
    %378 = arith.negf %376 : vector<8x128xf32>
    %379 = math.exp %378 : vector<8x128xf32>
    %cst_107 = arith.constant 1.000000e+00 : f32
    %380 = vector.broadcast %cst_107 : f32 to vector<8x128xf32>
    %381 = arith.addf %380, %379 : vector<8x128xf32>
    %382 = arith.divf %380, %381 : vector<8x128xf32>
    %383 = arith.select %16, %377, %382 : vector<8x128xi1>, vector<8x128xf32>
    %384 = vector.extract_strided_slice %383 {offsets = [0, 0], sizes = [8, 32], strides = [1, 1]} : vector<8x128xf32> to vector<8x32xf32>
    %385 = vector.extract_strided_slice %383 {offsets = [0, 32], sizes = [8, 32], strides = [1, 1]} : vector<8x128xf32> to vector<8x32xf32>
    %386 = vector.extract_strided_slice %383 {offsets = [0, 64], sizes = [8, 32], strides = [1, 1]} : vector<8x128xf32> to vector<8x32xf32>
    %387 = vector.extract_strided_slice %383 {offsets = [0, 96], sizes = [8, 32], strides = [1, 1]} : vector<8x128xf32> to vector<8x32xf32>
    %388 = arith.mulf %385, %328 : vector<8x32xf32>
    %389 = arith.mulf %384, %386 : vector<8x32xf32>
    %390 = arith.addf %388, %389 : vector<8x32xf32>
    %391 = math.tanh %390 : vector<8x32xf32>
    %392 = arith.mulf %387, %391 : vector<8x32xf32>
    %c0_108 = arith.constant 0 : index
    %c0_109 = arith.constant 0 : index
    %393 = vector.load %arg12[%c0_108, %c0_109] : memref<8x32xf32, #tpu.memory_space<vmem>>, vector<8x32xf32>
    %394 = arith.mulf %368, %393 : vector<8x32xf32>
    %c0_110 = arith.constant 0 : index
    %c0_111 = arith.constant 0 : index
    %395 = vector.load %arg13[%c0_110, %c0_111] : memref<8x32xf32, #tpu.memory_space<vmem>>, vector<8x32xf32>
    %396 = arith.mulf %366, %395 : vector<8x32xf32>
    %397 = arith.addf %394, %396 : vector<8x32xf32>
    %cst_112 = arith.constant dense<0.000000e+00> : vector<8xf32>
    %398 = vector.multi_reduction <add>, %397, %cst_112 [1] : vector<8x32xf32> to vector<8xf32>
    %399 = vector.shape_cast %398 : vector<8xf32> to vector<8x1xf32>
    %c0_113 = arith.constant 0 : index
    %c0_114 = arith.constant 0 : index
    %400 = vector.load %arg12[%c0_113, %c0_114] : memref<8x32xf32, #tpu.memory_space<vmem>>, vector<8x32xf32>
    %401 = arith.mulf %392, %400 : vector<8x32xf32>
    %c0_115 = arith.constant 0 : index
    %c0_116 = arith.constant 0 : index
    %402 = vector.load %arg13[%c0_115, %c0_116] : memref<8x32xf32, #tpu.memory_space<vmem>>, vector<8x32xf32>
    %403 = arith.mulf %390, %402 : vector<8x32xf32>
    %404 = arith.addf %401, %403 : vector<8x32xf32>
    %cst_117 = arith.constant dense<0.000000e+00> : vector<8xf32>
    %405 = vector.multi_reduction <add>, %404, %cst_117 [1] : vector<8x32xf32> to vector<8xf32>
    %406 = vector.shape_cast %405 : vector<8xf32> to vector<8x1xf32>
    %c0_118 = arith.constant 0 : index
    %c0_119 = arith.constant 0 : index
    %407 = vector.load %arg14[%c0_118, %c0_119] : memref<8x8xf32, #tpu.memory_space<vmem>>, vector<8x8xf32>
    %cst_120 = arith.constant dense<0.000000e+00> : vector<8x1xf32>
    %408 = tpu.matmul %407, %399, %cst_120 {dimension_numbers = #tpu.dot_dimension_numbers<[1], [0], [0], [1], [0, 0, 1, 1], [], []>} : vector<8x8xf32>, vector<8x1xf32>, vector<8x1xf32> -> vector<8x1xf32>
    %c0_121 = arith.constant 0 : index
    %c0_122 = arith.constant 0 : index
    %409 = vector.load %arg15[%c0_121, %c0_122] : memref<8x8xf32, #tpu.memory_space<vmem>>, vector<8x8xf32>
    %cst_123 = arith.constant dense<0.000000e+00> : vector<8x1xf32>
    %410 = tpu.matmul %409, %406, %cst_123 {dimension_numbers = #tpu.dot_dimension_numbers<[1], [0], [0], [1], [0, 0, 1, 1], [], []>} : vector<8x8xf32>, vector<8x1xf32>, vector<8x1xf32> -> vector<8x1xf32>
    %411 = arith.addf %408, %410 : vector<8x1xf32>
    %c0_124 = arith.constant 0 : index
    %c0_125 = arith.constant 0 : index
    %412 = vector.load %arg16[%c0_124, %c0_125] : memref<1x1xf32, #tpu.memory_space<vmem>>, vector<1x1xf32>
    %413 = vector.broadcast %412 : vector<1x1xf32> to vector<8x1xf32>
    %414 = arith.addf %411, %413 : vector<8x1xf32>
    %c0_126 = arith.constant 0 : index
    %c0_127 = arith.constant 0 : index
    %415 = vector.load %arg17[%c0_126, %c0_127] : memref<8x1xf32, #tpu.memory_space<vmem>>, vector<8x1xf32>
    tpu.vector_store %arg17[%c0_126, %c0_127], %414 {strides = array<i32>} : memref<8x1xf32, #tpu.memory_space<vmem>>, vector<8x1xf32>,
    return
  }
}

</mosaic_0001>

<bundles_post_ra>
// kernel: gcn_rnn_net_forward.1
= control target key start
LH: loop header
LB: loop body
LE: loop exit
PB: predicated region body
PF: predicated region fallthrough
CT: control target
= control target key end

     0   :  { %vm141_vm0 = vcmask 1043456   ;;  %vm122_vm1 = vcmask 64512   ;;  %vm198_vm2 = vcmask 130048   ;;  %v1706_v25 = vmov 0   ;;  %s1708_s20 = smov 32   ;;  %s1709_s22 = smov 96   ;;  %s2225_s3 = inlined_call_operand.vmem [shape: bf16[8,16], index: 3, kind: input, shape index: {}]   ;;  %s2226_s0 = inlined_call_operand.vmem [shape: bf16[96,8], index: 0, kind: input, shape index: {}]   ;;  %s2227_s4 = inlined_call_operand.vmem [shape: f32[1,16], index: 4, kind: input, shape index: {}]   ;;  %s2228_s1 = inlined_call_operand.vmem [shape: bf16[16,16], index: 1, kind: input, shape index: {}]   ;;  %s2229_s8 = inlined_call_operand.vmem [shape: bf16[32,128], index: 8, kind: input, shape index: {}]   ;;  %s2230_s5 = inlined_call_operand.vmem [shape: f32[6,16,16], index: 5, kind: input, shape index: {}]   ;;  %s2231_s2 = inlined_call_operand.vmem [shape: bf16[8,16], index: 2, kind: input, shape index: {}]   ;;  %s2232_s6 = inlined_call_operand.vmem [shape: bf16[16,128], index: 6, kind: input, shape index: {}]   ;;  %s2233_s7 = inlined_call_operand.vmem [shape: f32[1,128], index: 7, kind: input, shape index: {}]   ;;  %s2234_s9 = inlined_call_operand.vmem [shape: f32[6,8,32], index: 9, kind: input, shape index: {}]   ;;  %s2235_s10 = inlined_call_operand.vmem [shape: bf16[64,128], index: 10, kind: input, shape index: {}]   ;;  %s2236_s11 = inlined_call_operand.vmem [shape: f32[1,128], index: 11, kind: input, shape index: {}]   ;;  %s2237_s13 = inlined_call_operand.vmem [shape: f32[8,32], index: 13, kind: input, shape index: {}]   ;;  %s2238_s12 = inlined_call_operand.vmem [shape: f32[8,32], index: 12, kind: input, shape index: {}]   ;;  %s2239_s14 = inlined_call_operand.vmem [shape: f32[8,8], index: 14, kind: input, shape index: {}]   ;;  %s2240_s15 = inlined_call_operand.vmem [shape: f32[8,8], index: 15, kind: input, shape index: {}]   ;;  %s2241_s16 = inlined_call_operand.<no memory space> [shape: f32[1,1], index: 16, kind: input, shape index: {}]   ;;  %s2242_s17 = inlined_call_operand.vmem [shape: f32[8,1], index: 17, kind: output, shape index: {}]  }
   0x1   :  { %2244 = sst [smem:[#allocation3_spill]] %s2225_s3  ;;  %v1810_v6 = vld [vmem:[%s2228_s1] sm:$0xff]  ;;  %v1817_v7 = vld [vmem:[%s2229_s8 + $0x8] sm:$0xff]  ;;  %v184_v40 = vlaneseq  ;;  %vm281_vm14 = vcmask 261120   ;;  %vm376_vm15 = vcmask 523264  }
   0x2   :  { %2245 = sst [smem:[#allocation4_spill]] %s2226_s0  ;;  %v1824_v8 = vld [vmem:[%s2227_s4] ss:$0 sm:$0xff]  ;;  %v223_v17 = vld [vmem:[%s2230_s5 + $0x8] sm:$0xff]  ;;  %s1707_s0 = smov 64  }
   0x3   :  { %s2246_s26 = sld [smem:[#allocation3_spill]]  ;;  %v222_v16 = vld [vmem:[%s2230_s5] sm:$0xff]  ;;  %v185_v42 = vand.u32 127, %v184_v40 }
   0x4   :  { %s2247_s29 = sld [smem:[#allocation4_spill]]  ;;  %v1837_v22 = vld [vmem:[%s2231_s2] sm:$0xf] }
   0x5   :  { %v1844_v23 = vld [vmem:[%s2232_s6] sm:$0xff]  ;;  %vm186_vm5 = vcmp.ge.s32.totalorder %v185_v42, 64  ;;  %vm187_vm6 = vcmp.lt.s32.totalorder %v185_v42, 96 }
   0x6   :  { %v1849_v24 = vld [vmem:[%s2229_s8] sm:$0xff]  ;;  %263 = vmatpush.bf16.msra.mxu3 %v1844_v23  ;;  %vm1866_vm8 = vmand %vm186_vm5, %vm187_vm6 }
   0x7   :  { %v1859_v31 = vld [vmem:[%s2233_s7] ss:$0 sm:$0xff] }
   0x9   :  { %v91_v0 = vld [vmem:[%s2246_s26] sm:$0xf] }
   0xa   :  { %v143_v1 = vsel %vm141_vm0, %v91_v0, 0  ;;  %v1591_v2 = vld [vmem:[%s2247_s29] sm:$0xff]  ;;  %v1592_v34 = vld [vmem:[%s2247_s29 + $0x8] sm:$0xff] }
   0xb   :  { %152 = vmatpush.bf16.msra.mxu0 %v143_v1 }
   0xe   :  { %1487 = vmatmul.msk.bf16.vlgmr.msra.gmra.mxu0 %vm122_vm1, %v1591_v2 }
   0xf   :  { %875 = vmatpush.bf16.msrb.mxu0 %v1817_v7 }
  0x13   :  { %876 = vmatpush.bf16.msrb.mxu0 %v1849_v24 }
  0x17   :  { %1043 = vmatpush.bf16.msra.mxu0 %v1844_v23 }
  0x1e   :  { %1488 = vmatmul.msk.bf16.gmra.mxu0 %vm122_vm1, %v1592_v34 }
  0x8b   :  { %v154_v3 = vpop.f32.mrf.mxu0 }
  0x93   :  { %v156_v4 = vpop.f32.mrf.mxu0 }
  0x94   :  { %v189_v5 = vpack.c.bf16 %v156_v4, %v154_v3  ;;  %v337_v3 = vld [vmem:[%s2234_s9] sm:$0xff] }
  0x96   :  { %209 = vmatpush.bf16.msra.mxu1 %v189_v5 }
  0x99   :  { %1497 = vmatmul.msk.bf16.vlgmr.msra.gmra.mxu1 %vm198_vm2, %v1810_v6 }
  0x9a   :  { %291 = vmatpush.bf16.msrb.mxu1 %v1817_v7 }
  0x9b   :  { %v159_v55 = vpop.f32.mrf.mxu0 }
  0x9e   :  { %292 = vmatpush.bf16.msrb.mxu1 %v1849_v24 }
  0xa3   :  { %v161_v56 = vpop.f32.mrf.mxu0 }
  0xa4   :  { %v431_v57 = vpack.c.bf16 %v161_v56, %v159_v55 }
  0xa6   :  { %439 = vmatpush.bf16.msrb.mxu3 %v431_v57 }
  0xa9   :  { %293 = vmatmul.bf16.vlgmr.msrb.gmra.mxu1 %v1706_v25 }
 0x116   :  { %v211_v9 = vpop.f32.mrf.mxu1 }
 0x117   :  { %v212_v10 = vadd.f32 %v1824_v8, %v211_v9  ;;  %v1532_v9 = vld [vmem:[%s2230_s5 + $0x10] sm:$0xff] }
 0x119   :  { %v218_v11 = vmul.f32 0.01, %v212_v10  ;;  %vm216_vm3 = vcmp.ge.f32.partialorder %v212_v10, 0.0 }
 0x11b   :  { %v220_v15 = vsel %vm216_vm3, %v212_v10, %v218_v11 }
 0x11c   :  { %v224_v19 = vmul.f32 %v222_v16, %v220_v15 }
 0x11e   :  { %v213_v12 = vpop.f32.mrf.mxu1 }
 0x11f   :  { %v214_v13 = vadd.f32 %v1824_v8, %v213_v12  ;;  %v1533_v12 = vld [vmem:[%s2230_s5 + $0x18] sm:$0xff] }
 0x121   :  { %vm217_vm4 = vcmp.ge.f32.partialorder %v214_v13, 0.0  ;;  %v219_v14 = vmul.f32 0.01, %v214_v13 }
 0x123   :  { %v221_v18 = vsel %vm217_vm4, %v214_v13, %v219_v14 }
 0x124   :  { %v225_v20 = vmul.f32 %v223_v17, %v221_v18  ;;  %v1899_v17 = vld [vmem:[%s2235_s10 + $0x18] sm:$0xff]  ;;  %v1905_v18 = vld [vmem:[%s2235_s10 + $0x10] sm:$0xff] }
 0x126   :  { %v226_v21 = vpack.c.bf16 %v225_v20, %v224_v19  ;;  %v294_v29 = vpop.f32.mrf.mxu1  ;;  %v1912_v19 = vld [vmem:[%s2235_s10 + $0x8] sm:$0xff] }
 0x128   :  { %237 = vmatpush.bf16.msra.mxu2 %v226_v21 }
 0x12b   :  { %1498 = vmatmul.msk.bf16.vlgmr.msra.gmra.mxu2 %vm198_vm2, %v1837_v22 }
 0x12c   :  { %384 = vmatpush.bf16.msrb.mxu2 %v1899_v17 }
 0x12e   :  { %v296_v30 = vpop.f32.mrf.mxu1 }
 0x130   :  { %385 = vmatpush.bf16.msrb.mxu2 %v1905_v18 }
 0x134   :  { %386 = vmatpush.bf16.msrb.mxu2 %v1912_v19 }
 0x1ae   :  { %v239_v26 = vpop.f32.mrf.mxu2 }
 0x1af   :  { %v243_v27 = vpack.c.bf16 %v239_v26, %v239_v26 }
 0x1b1   :  { %1503 = vmatmul.msk.bf16.vlgmr.msra.gmra.mxu3 %vm198_vm2, %v243_v27 }
 0x1b2   :  { %501 = vmatpush.bf16.msra.mxu3 %v1817_v7 }
 0x1b6   :  { %v241_v28 = vpop.f32.mrf.mxu2  ;;  %502 = vmatpush.bf16.msra.mxu3 %v1849_v24 }
 0x1b7   :  { %v1922_v28 = vld [vmem:[%s2235_s10] sm:$0xff] }
 0x1b8   :  { %387 = vmatpush.bf16.msrb.mxu2 %v1922_v28 }
 0x1bc   :  { %482 = vmatpush.bf16.msra.mxu2 %v1844_v23 }
 0x1c1   :  { %1531 = vmatmul.msk.bf16.vlgmr.msrb.gmra.mxu3 %vm198_vm2, %v1810_v6 }
 0x234   :  { %v265_v32 = vpop.f32.mrf.mxu3 }
 0x235   :  { %v266_v33 = vadd.f32 %v1859_v31, %v265_v32 }
 0x237   :  { %v298_v35 = vadd.f32 %v294_v29, %v266_v33 }
 0x239   :  { %v1512_v36 = vmul.f32 -1.442695, %v298_v35 }
 0x23b   :  { %1605 = vpow2.f32 %v1512_v36 }
 0x23c   :  { %v267_v37 = vpop.f32.mrf.mxu3 }
 0x23d   :  { %v1935_v37 = vld [vmem:[%s2236_s11] ss:$0 sm:$0xff] }
 0x241   :  { %v1606_v38 = vpop.eup %1605 }
 0x242   :  { %v303_v39 = vadd.f32 1.0, %v1606_v38 }
 0x244   :  { %1607 = vrcp.f32 %v303_v39  ;;  %v315_v45 = vand.u32 2147483648, %v303_v39  ;;  %v313_v47 = vand.u32 2147483647, %v303_v39  ;;  %vm309_vm9 = vweird.f32 %v303_v39  ;;  %v441_v0 = vpop.f32.mrf.mxu3 }
 0x245   :  { %1609 = vtanh.f32 %v298_v35  ;;  %v442_v1 = vadd.f32 %v1824_v8, %v441_v0 }
 0x246   :  { %v316_v50 = vor.u32 1.1754944e-38, %v315_v45  ;;  %vm314_vm11 = vcmp.eq.f32.partialorder %v313_v47, 8.507059e+37 }
 0x247   :  { %v448_v2 = vmul.f32 0.01, %v442_v1  ;;  %vm446_vm12 = vcmp.ge.f32.partialorder %v442_v1, 0.0 }
 0x249   :  { %v450_v5 = vsel %vm446_vm12, %v442_v1, %v448_v2 }
 0x24a   :  { %v1608_v41 = vpop.eup %1607  ;;  %v455_v13 = vmul.f32 %v1532_v9, %v450_v5 }
 0x24b   :  { %v305_v43 = vmul.f32 %v1608_v41, %v303_v39  ;;  %vm310_vm7 = vweird.f32 %v1608_v41  ;;  %v1610_v52 = vpop.eup %1609 }
 0x24c   :  { %vm311_vm10 = vmor %vm309_vm9, %vm310_vm7  ;;  %v443_v4 = vpop.f32.mrf.mxu3 }
 0x24d   :  { %v306_v44 = vsub.f32 1.0, %v305_v43  ;;  %v444_v10 = vadd.f32 %v1824_v8, %v443_v4 }
 0x24f   :  { %v307_v46 = vmul.f32 %v1608_v41, %v306_v44  ;;  %vm447_vm13 = vcmp.ge.f32.partialorder %v444_v10, 0.0  ;;  %v449_v11 = vmul.f32 0.01, %v444_v10 }
 0x251   :  { %v308_v49 = vadd.f32 %v1608_v41, %v307_v46  ;;  %v451_v14 = vsel %vm447_vm13, %v444_v10, %v449_v11 }
 0x252   :  { %v456_v15 = vmul.f32 %v1533_v12, %v451_v14 }
 0x253   :  { %v312_v51 = vsel %vm311_vm10, %v1608_v41, %v308_v49  ;;  %v1593_v49 = vld [vmem:[%s2247_s29 + $0x10] sm:$0xff] }
 0x254   :  { %v317_v53 = vsel %vm314_vm11, %v316_v50, %v312_v51  ;;  %v457_v16 = vpack.c.bf16 %v456_v15, %v455_v13  ;;  %1489 = vmatmul.msk.bf16.gmra.mxu0 %vm122_vm1, %v1593_v49  ;;  %v1542_v49 = vld [vmem:[%s2230_s5 + $0x20] sm:$0xff] }
 0x255   :  { %v319_v54 = vsel %vm1866_vm8, %v1610_v52, %v317_v53 }
 0x256   :  { %322 = vrot.lane.b32.xlu0 %v319_v54, %s1707_s0  ;;  %v320_v60 = vmul.f32 0.0, %v319_v54  ;;  %465 = vmatpush.bf16.msra.mxu1 %v457_v16 }
 0x259   :  { %1534 = vmatmul.msk.bf16.vlgmr.msra.gmra.mxu1 %vm198_vm2, %v1837_v22 }
 0x25a   :  { %571 = vmatpush.bf16.msrb.mxu1 %v1899_v17 }
 0x25e   :  { %572 = vmatpush.bf16.msrb.mxu1 %v1905_v18 }
 0x262   :  { %573 = vmatpush.bf16.msrb.mxu1 %v1912_v19 }
 0x266   :  { %574 = vmatpush.bf16.msrb.mxu1 %v1922_v28 }
 0x26a   :  { %669 = vmatpush.bf16.msra.mxu1 %v1844_v23 }
 0x2c8   :  { %v323_v58 = vpop.permute.xlu0 %322 }
 0x2c9   :  { %v325_v59 = vmul.f32 %v323_v58, %v319_v54 }
 0x2cb   :  { %327 = vrot.lane.b32.xlu0 %v325_v59, %s1708_s20 }
 0x2d6   :  { %v467_v29 = vpop.f32.mrf.mxu1 }
 0x2d7   :  { %v471_v36 = vpack.c.bf16 %v467_v29, %v467_v29 }
 0x2de   :  { %v469_v30 = vpop.f32.mrf.mxu1 }
 0x33d   :  { %v328_v61 = vpop.permute.xlu0 %327 }
 0x33e   :  { %v1878_v62 = vadd.f32 %v328_v61, %v320_v60 }
 0x340   :  { %1611 = vtanh.f32 %v1878_v62 }
 0x346   :  { %v1612_v63 = vpop.eup %1611 }
 0x347   :  { %333 = vrot.lane.b32.xlu1 %v1612_v63, %s1707_s0 }
 0x34f   :  { %339 = vrot.lane.b32.xlu1 %v337_v3, %s1709_s22 }
 0x3b9   :  { %v334_v20 = vpop.permute.xlu1 %333 }
 0x3ba   :  { %v336_v21 = vmul.f32 %v334_v20, %v319_v54 }
 0x3bc   :  { %v488_v27 = vpack.c.bf16 %v336_v21, %v336_v21 }
 0x3c1   :  { %v340_v25 = vpop.permute.xlu1 %339 }
 0x3c2   :  { %v342_v26 = vmul.f32 %v340_v25, %v336_v21  ;;  %v164_v25 = vpop.f32.mrf.mxu0 }
 0x3c4   :  { %344 = vrot.lane.b32.xlu2 %v342_v26, %s1708_s20 }
 0x3ca   :  { %v166_v29 = vpop.f32.mrf.mxu0 }
 0x3cb   :  { %v618_v30 = vpack.c.bf16 %v166_v29, %v164_v25 }
 0x3cc   :  { %490 = vrot.lane.b32.xlu2 %v488_v27, %s1708_s20 }
 0x41e   :  { %v345_v32 = vpop.permute.xlu2 %344 }
 0x41f   :  { %v347_v33 = vsel %vm281_vm14, %v345_v32, 0.0 }
 0x420   :  { %v348_v34 = vpack.c.bf16 %v347_v33, %v347_v33 }
 0x422   :  { %1529 = vmatmul.msk.bf16.vlgmr.msrb.gmra.mxu2 %vm376_vm15, %v348_v34  ;;  %v1538_v34 = vld [vmem:[%s2234_s9 + $0x8] sm:$0xff] }
 0x423   :  { %626 = vmatpush.bf16.msrb.mxu2 %v618_v30 }
 0x426   :  { %v491_v35 = vpop.permute.xlu2 %490 }
 0x427   :  { %1536 = vmatmul.msk.bf16.vlgmr.msra.gmra.mxu3 %vm281_vm14, %v491_v35 }
 0x432   :  { %1535 = vmatmul.msk.bf16.vlgmr.msra.gmra.mxu2 %vm198_vm2, %v471_v36 }
 0x433   :  { %688 = vmatpush.bf16.msra.mxu2 %v1817_v7 }
 0x437   :  { %689 = vmatpush.bf16.msra.mxu2 %v1849_v24 }
 0x442   :  { %1541 = vmatmul.msk.bf16.vlgmr.msrb.gmra.mxu2 %vm198_vm2, %v1810_v6 }
 0x4a5   :  { %v389_v38 = vpop.f32.mrf.mxu2 }
 0x4a6   :  { %v390_v39 = vadd.f32 %v1935_v37, %v389_v38 }
 0x4a8   :  { %v1530_v40 = vmul.f32 -1.442695, %v390_v39 }
 0x4aa   :  { %1613 = vpow2.f32 %v1530_v40  ;;  %v504_v41 = vpop.f32.mrf.mxu3 }
 0x4ad   :  { %v391_v42 = vpop.f32.mrf.mxu2 }
 0x4b0   :  { %v1614_v43 = vpop.eup %1613 }
 0x4b1   :  { %v397_v44 = vadd.f32 1.0, %v1614_v43 }
 0x4b2   :  { %v506_v45 = vpop.f32.mrf.mxu3 }
 0x4b3   :  { %1615 = vrcp.f32 %v397_v44  ;;  %v409_v56 = vand.u32 2147483648, %v397_v44  ;;  %v407_v58 = vand.u32 2147483647, %v397_v44  ;;  %vm403_vm3 = vweird.f32 %v397_v44 }
 0x4b5   :  { %v484_v46 = vpop.f32.mrf.mxu2  ;;  %v410_v60 = vor.u32 1.1754944e-38, %v409_v56  ;;  %vm408_vm5 = vcmp.eq.f32.partialorder %v407_v58, 8.507059e+37 }
 0x4b6   :  { %v485_v47 = vadd.f32 %v1859_v31, %v484_v46 }
 0x4b8   :  { %v508_v50 = vadd.f32 %v504_v41, %v485_v47 }
 0x4b9   :  { %v1616_v51 = vpop.eup %1615 }
 0x4ba   :  { %v1537_v52 = vmul.f32 -1.442695, %v508_v50  ;;  %v399_v53 = vmul.f32 %v1616_v51, %v397_v44  ;;  %vm404_vm0 = vweird.f32 %v1616_v51 }
 0x4bb   :  { %vm405_vm4 = vmor %vm403_vm3, %vm404_vm0 }
 0x4bc   :  { %1617 = vpow2.f32 %v1537_v52  ;;  %v400_v54 = vsub.f32 1.0, %v399_v53  ;;  %v1543_v52 = vld [vmem:[%s2230_s5 + $0x28] sm:$0xff] }
 0x4bd   :  { %1619 = vtanh.f32 %v390_v39  ;;  %v486_v55 = vpop.f32.mrf.mxu2 }
 0x4be   :  { %v401_v57 = vmul.f32 %v1616_v51, %v400_v54 }
 0x4c0   :  { %v402_v59 = vadd.f32 %v1616_v51, %v401_v57 }
 0x4c2   :  { %v1618_v61 = vpop.eup %1617  ;;  %v406_v63 = vsel %vm405_vm4, %v1616_v51, %v402_v59 }
 0x4c3   :  { %v1620_v0 = vpop.eup %1619  ;;  %v513_v1 = vadd.f32 1.0, %v1618_v61  ;;  %v411_v2 = vsel %vm408_vm5, %v410_v60, %v406_v63 }
 0x4c4   :  { %v1945_v3 = vsel %vm1866_vm8, %v1620_v0, %v411_v2 }
 0x4c5   :  { %1621 = vrcp.f32 %v513_v1  ;;  %416 = vrot.lane.b32.xlu1 %v1945_v3, %s1707_s0  ;;  %v525_v10 = vand.u32 2147483648, %v513_v1  ;;  %v523_v12 = vand.u32 2147483647, %v513_v1  ;;  %vm519_vm7 = vweird.f32 %v513_v1  ;;  %v628_v44 = vpop.f32.mrf.mxu2 }
 0x4c6   :  { %1623 = vtanh.f32 %v508_v50  ;;  %v414_v39 = vmul.f32 0.0, %v1945_v3 }
 0x4c7   :  { %v526_v14 = vor.u32 1.1754944e-38, %v525_v10  ;;  %vm524_vm10 = vcmp.eq.f32.partialorder %v523_v12, 8.507059e+37 }
 0x4cb   :  { %v1622_v4 = vpop.eup %1621 }
 0x4cc   :  { %v515_v5 = vmul.f32 %v1622_v4, %v513_v1  ;;  %vm520_vm6 = vweird.f32 %v1622_v4  ;;  %v1624_v16 = vpop.eup %1623 }
 0x4cd   :  { %vm521_vm9 = vmor %vm519_vm7, %vm520_vm6  ;;  %v630_v46 = vpop.f32.mrf.mxu2 }
 0x4ce   :  { %v516_v9 = vsub.f32 1.0, %v515_v5  ;;  %v631_v50 = vadd.f32 %v1824_v8, %v630_v46 }
 0x4d0   :  { %v517_v11 = vmul.f32 %v1622_v4, %v516_v9  ;;  %vm634_vm12 = vcmp.ge.f32.partialorder %v631_v50, 0.0  ;;  %v636_v51 = vmul.f32 0.01, %v631_v50 }
 0x4d2   :  { %v518_v13 = vadd.f32 %v1622_v4, %v517_v11  ;;  %v638_v54 = vsel %vm634_vm12, %v631_v50, %v636_v51 }
 0x4d3   :  { %v643_v55 = vmul.f32 %v1543_v52, %v638_v54 }
 0x4d4   :  { %v522_v15 = vsel %vm521_vm9, %v1622_v4, %v518_v13 }
 0x4d5   :  { %v527_v20 = vsel %vm524_vm10, %v526_v14, %v522_v15 }
 0x4d6   :  { %v529_v21 = vsel %vm1866_vm8, %v1624_v16, %v527_v20 }
 0x4d7   :  { %532 = vrot.lane.b32.xlu0 %v529_v21, %s1707_s0  ;;  %v530_v35 = vmul.f32 %v529_v21, %v1878_v62  ;;  %v629_v62 = vadd.f32 %v1824_v8, %v628_v44 }
 0x4d9   :  { %v635_v45 = vmul.f32 0.01, %v629_v62  ;;  %vm633_vm11 = vcmp.ge.f32.partialorder %v629_v62, 0.0 }
 0x4db   :  { %v637_v47 = vsel %vm633_vm11, %v629_v62, %v635_v45 }
 0x4dc   :  { %v642_v53 = vmul.f32 %v1542_v49, %v637_v47 }
 0x4de   :  { %v644_v56 = vpack.c.bf16 %v643_v55, %v642_v53 }
 0x4e0   :  { %652 = vmatpush.bf16.msrb.mxu3 %v644_v56 }
 0x4e3   :  { %1544 = vmatmul.msk.bf16.vlgmr.msrb.gmra.mxu3 %vm198_vm2, %v1837_v22 }
 0x4e4   :  { %758 = vmatpush.bf16.msra.mxu3 %v1899_v17 }
 0x4e8   :  { %759 = vmatpush.bf16.msra.mxu3 %v1905_v18 }
 0x4ec   :  { %760 = vmatpush.bf16.msra.mxu3 %v1912_v19 }
 0x4f0   :  { %761 = vmatpush.bf16.msra.mxu3 %v1922_v28 }
 0x4f4   :  { %856 = vmatpush.bf16.msrb.mxu3 %v1844_v23 }
 0x537   :  { %v417_v26 = vpop.permute.xlu1 %416 }
 0x538   :  { %v419_v27 = vmul.f32 %v417_v26, %v1945_v3 }
 0x53a   :  { %421 = vrot.lane.b32.xlu0 %v419_v27, %s1708_s20  ;;  %v1594_v27 = vld [vmem:[%s2247_s29 + $0x18] sm:$0xff] }
 0x53b   :  { %1490 = vmatmul.msk.bf16.gmra.mxu0 %vm122_vm1, %v1594_v27 }
 0x542   :  { %550 = vrot.lane.b32.xlu0 %v1538_v34, %s1709_s22 }
 0x549   :  { %v533_v32 = vpop.permute.xlu0 %532 }
 0x54a   :  { %v535_v33 = vmul.f32 %v533_v32, %v529_v21 }
 0x54c   :  { %537 = vrot.lane.b32.xlu2 %v535_v33, %s1708_s20 }
 0x566   :  { %v654_v1 = vpop.f32.mrf.mxu3 }
 0x567   :  { %v658_v10 = vpack.c.bf16 %v654_v1, %v654_v1 }
 0x56e   :  { %v656_v2 = vpop.f32.mrf.mxu3 }
 0x5a6   :  { %v538_v36 = vpop.permute.xlu2 %537 }
 0x5a7   :  { %v1964_v38 = vadd.f32 %v538_v36, %v530_v35 }
 0x5a9   :  { %1625 = vtanh.f32 %v1964_v38 }
 0x5ac   :  { %v422_v40 = vpop.permute.xlu0 %421 }
 0x5ad   :  { %v1968_v41 = vadd.f32 %v422_v40, %v414_v39 }
 0x5af   :  { %v1626_v42 = vpop.eup %1625  ;;  %1627 = vtanh.f32 %v1968_v41 }
 0x5b0   :  { %543 = vrot.lane.b32.xlu1 %v1626_v42, %s1707_s0 }
 0x5b4   :  { %v551_v60 = vpop.permute.xlu0 %550 }
 0x5b5   :  { %v1628_v43 = vpop.eup %1627 }
 0x5b6   :  { %427 = vrot.lane.b32.xlu2 %v1628_v43, %s1707_s0 }
 0x5b8   :  { %v169_v1 = vpop.f32.mrf.mxu0 }
 0x5c0   :  { %v171_v2 = vpop.f32.mrf.mxu0 }
 0x610   :  { %v428_v57 = vpop.permute.xlu2 %427 }
 0x611   :  { %v430_v58 = vmul.f32 %v428_v57, %v1945_v3 }
 0x613   :  { %559 = vrot.lane.b32.xlu2 %v430_v58, %s1707_s0 }
 0x622   :  { %v544_v59 = vpop.permute.xlu1 %543 }
 0x623   :  { %v546_v61 = vmul.f32 %v544_v59, %v529_v21 }
 0x625   :  { %v675_v63 = vpack.c.bf16 %v546_v61, %v546_v61  ;;  %v553_v0 = vmul.f32 %v551_v60, %v546_v61 }
 0x627   :  { %677 = vrot.lane.b32.xlu0 %v675_v63, %s1708_s20  ;;  %555 = vrot.lane.b32.xlu1 %v553_v0, %s1708_s20 }
 0x66d   :  { %v560_v4 = vpop.permute.xlu2 %559 }
 0x699   :  { %v678_v5 = vpop.permute.xlu0 %677  ;;  %v556_v9 = vpop.permute.xlu1 %555 }
 0x69a   :  { %v562_v23 = vsel %vm281_vm14, %v556_v9, %v560_v4  ;;  %1546 = vmatmul.msk.bf16.vlgmr.msra.gmra.mxu2 %vm281_vm14, %v678_v5  ;;  %v805_v4 = vpack.c.bf16 %v171_v2, %v169_v1  ;;  %v1562_v2 = vld [vmem:[%s2230_s5 + $0x40] sm:$0xff] }
 0x69b   :  { %v563_v3 = vpack.c.bf16 %v562_v23, %v562_v23  ;;  %v1548_v23 = vld [vmem:[%s2234_s9 + $0x10] sm:$0xff] }
 0x69d   :  { %1539 = vmatmul.msk.bf16.vlgmr.msrb.gmra.mxu1 %vm376_vm15, %v563_v3 }
 0x69e   :  { %813 = vmatpush.bf16.msrb.mxu1 %v805_v4 }
 0x6ad   :  { %1545 = vmatmul.msk.bf16.vlgmr.msra.gmra.mxu1 %vm198_vm2, %v658_v10 }
 0x6ae   :  { %945 = vmatpush.bf16.msra.mxu1 %v1899_v17 }
 0x6b2   :  { %946 = vmatpush.bf16.msra.mxu1 %v1905_v18 }
 0x6b6   :  { %947 = vmatpush.bf16.msra.mxu1 %v1912_v19 }
 0x6ba   :  { %948 = vmatpush.bf16.msra.mxu1 %v1922_v28 }
 0x6bd   :  { %1551 = vmatmul.msk.bf16.vlgmr.msrb.gmra.mxu1 %vm198_vm2, %v1810_v6 }
 0x6be   :  { %1062 = vmatpush.bf16.msrb.mxu1 %v1817_v7 }
 0x6c2   :  { %1063 = vmatpush.bf16.msrb.mxu1 %v1849_v24 }
 0x71a   :  { %v576_v11 = vpop.f32.mrf.mxu1 }
 0x71b   :  { %v577_v12 = vadd.f32 %v1935_v37, %v576_v11 }
 0x71d   :  { %v1540_v13 = vmul.f32 -1.442695, %v577_v12  ;;  %v691_v14 = vpop.f32.mrf.mxu2 }
 0x71f   :  { %1629 = vpow2.f32 %v1540_v13  ;;  %v1595_v13 = vld [vmem:[%s2247_s29 + $0x20] sm:$0xff] }
 0x720   :  { %1491 = vmatmul.msk.bf16.gmra.mxu0 %vm122_vm1, %v1595_v13 }
 0x722   :  { %v578_v15 = vpop.f32.mrf.mxu1 }
 0x725   :  { %v1630_v16 = vpop.eup %1629  ;;  %v693_v20 = vpop.f32.mrf.mxu2 }
 0x726   :  { %v584_v21 = vadd.f32 1.0, %v1630_v16 }
 0x728   :  { %1631 = vrcp.f32 %v584_v21  ;;  %v596_v36 = vand.u32 2147483648, %v584_v21  ;;  %v594_v40 = vand.u32 2147483647, %v584_v21  ;;  %vm590_vm0 = vweird.f32 %v584_v21 }
 0x72a   :  { %v671_v25 = vpop.f32.mrf.mxu1  ;;  %v597_v43 = vor.u32 1.1754944e-38, %v596_v36  ;;  %vm595_vm4 = vcmp.eq.f32.partialorder %v594_v40, 8.507059e+37 }
 0x72b   :  { %v672_v26 = vadd.f32 %v1859_v31, %v671_v25 }
 0x72d   :  { %v695_v29 = vadd.f32 %v691_v14, %v672_v26 }
 0x72e   :  { %v1632_v30 = vpop.eup %1631 }
 0x72f   :  { %v1547_v32 = vmul.f32 -1.442695, %v695_v29  ;;  %v586_v33 = vmul.f32 %v1632_v30, %v584_v21  ;;  %vm591_vm13 = vweird.f32 %v1632_v30 }
 0x730   :  { %vm592_vm3 = vmor %vm590_vm0, %vm591_vm13 }
 0x731   :  { %1633 = vpow2.f32 %v1547_v32  ;;  %v587_v34 = vsub.f32 1.0, %v586_v33  ;;  %v1553_v32 = vld [vmem:[%s2230_s5 + $0x38] sm:$0xff] }
 0x732   :  { %1635 = vtanh.f32 %v577_v12  ;;  %v673_v35 = vpop.f32.mrf.mxu1 }
 0x733   :  { %v588_v39 = vmul.f32 %v1632_v30, %v587_v34 }
 0x735   :  { %v589_v42 = vadd.f32 %v1632_v30, %v588_v39 }
 0x737   :  { %v1634_v44 = vpop.eup %1633  ;;  %v593_v62 = vsel %vm592_vm3, %v1632_v30, %v589_v42 }
 0x738   :  { %v1636_v45 = vpop.eup %1635  ;;  %v700_v46 = vadd.f32 1.0, %v1634_v44  ;;  %v598_v47 = vsel %vm595_vm4, %v597_v43, %v593_v62 }
 0x739   :  { %v2004_v49 = vsel %vm1866_vm8, %v1636_v45, %v598_v47 }
 0x73a   :  { %1637 = vrcp.f32 %v700_v46  ;;  %603 = vrot.lane.b32.xlu2 %v2004_v49, %s1707_s0  ;;  %v712_v53 = vand.u32 2147483648, %v700_v46  ;;  %v710_v55 = vand.u32 2147483647, %v700_v46  ;;  %vm706_vm6 = vweird.f32 %v700_v46 }
 0x73b   :  { %1639 = vtanh.f32 %v695_v29  ;;  %v601_v3 = vmul.f32 %v2004_v49, %v1968_v41  ;;  %v815_v41 = vpop.f32.mrf.mxu1  ;;  %v1552_v29 = vld [vmem:[%s2230_s5 + $0x30] sm:$0xff] }
 0x73c   :  { %v713_v57 = vor.u32 1.1754944e-38, %v712_v53  ;;  %vm711_vm9 = vcmp.eq.f32.partialorder %v710_v55, 8.507059e+37  ;;  %v816_v20 = vadd.f32 %v1824_v8, %v815_v41 }
 0x73e   :  { %v822_v21 = vmul.f32 0.01, %v816_v20  ;;  %vm820_vm10 = vcmp.ge.f32.partialorder %v816_v20, 0.0 }
 0x740   :  { %v1638_v50 = vpop.eup %1637  ;;  %v824_v27 = vsel %vm820_vm10, %v816_v20, %v822_v21 }
 0x741   :  { %v702_v51 = vmul.f32 %v1638_v50, %v700_v46  ;;  %vm707_vm5 = vweird.f32 %v1638_v50  ;;  %v1640_v59 = vpop.eup %1639  ;;  %v829_v33 = vmul.f32 %v1552_v29, %v824_v27 }
 0x742   :  { %vm708_vm7 = vmor %vm706_vm6, %vm707_vm5 }
 0x743   :  { %v703_v52 = vsub.f32 1.0, %v702_v51  ;;  %v817_v26 = vpop.f32.mrf.mxu1 }
 0x745   :  { %v704_v54 = vmul.f32 %v1638_v50, %v703_v52 }
 0x747   :  { %v705_v56 = vadd.f32 %v1638_v50, %v704_v54 }
 0x749   :  { %v709_v58 = vsel %vm708_vm7, %v1638_v50, %v705_v56 }
 0x74a   :  { %v714_v60 = vsel %vm711_vm9, %v713_v57, %v709_v58 }
 0x74b   :  { %v716_v61 = vsel %vm1866_vm8, %v1640_v59, %v714_v60 }
 0x74c   :  { %719 = vrot.lane.b32.xlu1 %v716_v61, %s1707_s0  ;;  %v717_v14 = vmul.f32 %v716_v61, %v1964_v38  ;;  %v818_v38 = vadd.f32 %v1824_v8, %v817_v26 }
 0x74e   :  { %vm821_vm11 = vcmp.ge.f32.partialorder %v818_v38, 0.0  ;;  %v823_v30 = vmul.f32 0.01, %v818_v38 }
 0x750   :  { %v825_v34 = vsel %vm821_vm11, %v818_v38, %v823_v30 }
 0x751   :  { %v830_v35 = vmul.f32 %v1553_v32, %v825_v34 }
 0x753   :  { %v831_v36 = vpack.c.bf16 %v830_v35, %v829_v33 }
 0x755   :  { %839 = vmatpush.bf16.msrb.mxu2 %v831_v36 }
 0x758   :  { %1554 = vmatmul.msk.bf16.vlgmr.msrb.gmra.mxu2 %vm198_vm2, %v1837_v22 }
 0x794   :  { %v604_v63 = vpop.permute.xlu2 %603 }
 0x795   :  { %v606_v0 = vmul.f32 %v604_v63, %v2004_v49 }
 0x797   :  { %608 = vrot.lane.b32.xlu1 %v606_v0, %s1708_s20 }
 0x79d   :  { %v174_v46 = vpop.f32.mrf.mxu0 }
 0x79f   :  { %737 = vrot.lane.b32.xlu1 %v1548_v23, %s1709_s22 }
 0x7a5   :  { %v176_v47 = vpop.f32.mrf.mxu0 }
 0x7a6   :  { %v992_v50 = vpack.c.bf16 %v176_v47, %v174_v46 }
 0x7a8   :  { %1000 = vmatpush.bf16.msra.mxu2 %v992_v50 }
 0x7ab   :  { %1561 = vmatmul.msk.bf16.vlgmr.msra.gmra.mxu2 %vm198_vm2, %v1810_v6 }
 0x7ac   :  { %1132 = vmatpush.bf16.msrb.mxu2 %v1899_v17 }
 0x7b0   :  { %1133 = vmatpush.bf16.msrb.mxu2 %v1905_v18 }
 0x7b4   :  { %1134 = vmatpush.bf16.msrb.mxu2 %v1912_v19 }
 0x7b8   :  { %1135 = vmatpush.bf16.msrb.mxu2 %v1922_v28 }
 0x7bc   :  { %1249 = vmatpush.bf16.msra.mxu2 %v1817_v7 }
 0x7be   :  { %v720_v5 = vpop.permute.xlu1 %719 }
 0x7bf   :  { %v722_v9 = vmul.f32 %v720_v5, %v716_v61  ;;  %v1563_v5 = vld [vmem:[%s2230_s5 + $0x48] sm:$0xff] }
 0x7c0   :  { %1250 = vmatpush.bf16.msra.mxu2 %v1849_v24 }
 0x7c1   :  { %724 = vrot.lane.b32.xlu0 %v722_v9, %s1708_s20 }
 0x7db   :  { %v841_v51 = vpop.f32.mrf.mxu2 }
 0x7dc   :  { %v845_v57 = vpack.c.bf16 %v841_v51, %v841_v51 }
 0x7e3   :  { %v843_v52 = vpop.f32.mrf.mxu2 }
 0x809   :  { %v609_v10 = vpop.permute.xlu1 %608 }
 0x80a   :  { %v2028_v11 = vadd.f32 %v609_v10, %v601_v3 }
 0x80c   :  { %1641 = vtanh.f32 %v2028_v11 }
 0x811   :  { %v738_v43 = vpop.permute.xlu1 %737 }
 0x812   :  { %v1642_v12 = vpop.eup %1641 }
 0x813   :  { %614 = vrot.lane.b32.xlu0 %v1642_v12, %s1707_s0 }
 0x82e   :  { %v1002_v7 = vpop.f32.mrf.mxu2 }
 0x82f   :  { %v1003_v59 = vadd.f32 %v1824_v8, %v1002_v7  ;;  %v1558_v7 = vld [vmem:[%s2234_s9 + $0x18] sm:$0xff] }
 0x831   :  { %vm1007_vm12 = vcmp.ge.f32.partialorder %v1003_v59, 0.0 }
 0x833   :  { %v725_v15 = vpop.permute.xlu0 %724 }
 0x834   :  { %v2037_v16 = vadd.f32 %v725_v15, %v717_v14 }
 0x836   :  { %1643 = vtanh.f32 %v2037_v16  ;;  %v1004_v24 = vpop.f32.mrf.mxu2 }
 0x837   :  { %v1005_v60 = vadd.f32 %v1824_v8, %v1004_v24 }
 0x839   :  { %v1010_v63 = vmul.f32 0.01, %v1005_v60  ;;  %vm1008_vm13 = vcmp.ge.f32.partialorder %v1005_v60, 0.0 }
 0x83b   :  { %v1012_v4 = vsel %vm1008_vm13, %v1005_v60, %v1010_v63 }
 0x83c   :  { %v1644_v25 = vpop.eup %1643  ;;  %v1017_v23 = vmul.f32 %v1563_v5, %v1012_v4 }
 0x83d   :  { %730 = vrot.lane.b32.xlu2 %v1644_v25, %s1707_s0 }
 0x885   :  { %v615_v39 = vpop.permute.xlu0 %614 }
 0x886   :  { %v617_v40 = vmul.f32 %v615_v39, %v2004_v49  ;;  %v1596_v49 = vld [vmem:[%s2247_s29 + $0x28] sm:$0xff] }
 0x887   :  { %1492 = vmatmul.msk.bf16.gmra.mxu0 %vm122_vm1, %v1596_v49 }
 0x888   :  { %746 = vrot.lane.b32.xlu0 %v617_v40, %s1707_s0 }
 0x897   :  { %v731_v42 = vpop.permute.xlu2 %730 }
 0x898   :  { %v733_v44 = vmul.f32 %v731_v42, %v716_v61  ;;  %v1009_v61 = vmul.f32 0.01, %v1003_v59 }
 0x89a   :  { %v862_v62 = vpack.c.bf16 %v733_v44, %v733_v44  ;;  %v740_v45 = vmul.f32 %v738_v43, %v733_v44  ;;  %v1011_v1 = vsel %vm1007_vm12, %v1003_v59, %v1009_v61 }
 0x89b   :  { %v1016_v9 = vmul.f32 %v1562_v2, %v1011_v1 }
 0x89c   :  { %864 = vrot.lane.b32.xlu1 %v862_v62, %s1708_s20  ;;  %742 = vrot.lane.b32.xlu2 %v740_v45, %s1708_s20 }
 0x89d   :  { %v1018_v10 = vpack.c.bf16 %v1017_v23, %v1016_v9 }
 0x8f6   :  { %v743_v53 = vpop.permute.xlu2 %742 }
 0x8fa   :  { %v747_v54 = vpop.permute.xlu0 %746 }
 0x8fb   :  { %v749_v55 = vsel %vm281_vm14, %v743_v53, %v747_v54 }
 0x8fc   :  { %v750_v56 = vpack.c.bf16 %v749_v55, %v749_v55 }
 0x8fe   :  { %1549 = vmatmul.msk.bf16.vlgmr.msra.gmra.mxu3 %vm376_vm15, %v750_v56 }
 0x8ff   :  { %1026 = vmatpush.bf16.msra.mxu3 %v1018_v10 }
 0x904   :  { %v179_v0 = vpop.f32.mrf.mxu0 }
 0x90c   :  { %v181_v3 = vpop.f32.mrf.mxu0 }
 0x90d   :  { %v1179_v8 = vpack.c.bf16 %v181_v3, %v179_v0 }
 0x90e   :  { %v865_v58 = vpop.permute.xlu1 %864  ;;  %1555 = vmatmul.msk.bf16.vlgmr.msrb.gmra.mxu3 %vm198_vm2, %v845_v57 }
 0x90f   :  { %1556 = vmatmul.msk.bf16.vlgmr.msrb.gmra.mxu0 %vm281_vm14, %v865_v58  ;;  %1187 = vmatpush.bf16.msrb.mxu3 %v1179_v8 }
 0x91e   :  { %1564 = vmatmul.msk.bf16.vlgmr.msra.gmra.mxu3 %vm198_vm2, %v1837_v22 }
 0x91f   :  { %1319 = vmatpush.bf16.msra.mxu3 %v1899_v17 }
 0x923   :  { %1320 = vmatpush.bf16.msra.mxu3 %v1905_v18 }
 0x927   :  { %1321 = vmatpush.bf16.msra.mxu3 %v1912_v19 }
 0x92b   :  { %1322 = vmatpush.bf16.msra.mxu3 %v1922_v28 }
 0x92e   :  { %1571 = vmatmul.msk.bf16.vlgmr.msrb.gmra.mxu3 %vm198_vm2, %v1810_v6 }
 0x981   :  { %v763_v12 = vpop.f32.mrf.mxu3 }
 0x982   :  { %v764_v13 = vadd.f32 %v1935_v37, %v763_v12 }
 0x984   :  { %v1550_v14 = vmul.f32 -1.442695, %v764_v13 }
 0x986   :  { %1645 = vpow2.f32 %v1550_v14 }
 0x989   :  { %v765_v15 = vpop.f32.mrf.mxu3 }
 0x98c   :  { %v1646_v41 = vpop.eup %1645  ;;  %v878_v20 = vpop.f32.mrf.mxu0 }
 0x98d   :  { %v771_v22 = vadd.f32 1.0, %v1646_v41 }
 0x98f   :  { %1647 = vrcp.f32 %v771_v22  ;;  %v783_v29 = vand.u32 2147483648, %v771_v22  ;;  %v781_v30 = vand.u32 2147483647, %v771_v22  ;;  %vm777_vm3 = vweird.f32 %v771_v22 }
 0x991   :  { %v858_v17 = vpop.f32.mrf.mxu3  ;;  %v784_v33 = vor.u32 1.1754944e-38, %v783_v29  ;;  %vm782_vm5 = vcmp.eq.f32.partialorder %v781_v30, 8.507059e+37 }
 0x992   :  { %v859_v18 = vadd.f32 %v1859_v31, %v858_v17 }
 0x994   :  { %v882_v21 = vadd.f32 %v878_v20, %v859_v18  ;;  %v880_v19 = vpop.f32.mrf.mxu0  ;;  %v1701_v20 = vld [vmem:[%s2232_s6] sm:$0xff] }
 0x995   :  { %v1648_v25 = vpop.eup %1647 }
 0x996   :  { %v1557_v28 = vmul.f32 -1.442695, %v882_v21  ;;  %v773_v26 = vmul.f32 %v1648_v25, %v771_v22  ;;  %vm778_vm0 = vweird.f32 %v1648_v25 }
 0x997   :  { %vm779_vm4 = vmor %vm777_vm3, %vm778_vm0 }
 0x998   :  { %1649 = vpow2.f32 %v1557_v28  ;;  %v774_v6 = vsub.f32 1.0, %v773_v26 }
 0x999   :  { %1651 = vtanh.f32 %v764_v13  ;;  %v860_v27 = vpop.f32.mrf.mxu3 }
 0x99a   :  { %v775_v38 = vmul.f32 %v1648_v25, %v774_v6 }
 0x99c   :  { %v776_v32 = vadd.f32 %v1648_v25, %v775_v38 }
 0x99e   :  { %v1650_v34 = vpop.eup %1649  ;;  %v780_v35 = vsel %vm779_vm4, %v1648_v25, %v776_v32 }
 0x99f   :  { %v1652_v36 = vpop.eup %1651  ;;  %v887_v39 = vadd.f32 1.0, %v1650_v34  ;;  %v785_v40 = vsel %vm782_vm5, %v784_v33, %v780_v35 }
 0x9a0   :  { %v787_v42 = vsel %vm1866_vm8, %v1652_v36, %v785_v40 }
 0x9a1   :  { %1653 = vrcp.f32 %v887_v39  ;;  %790 = vrot.lane.b32.xlu0 %v787_v42, %s1707_s0  ;;  %v899_v45 = vand.u32 2147483648, %v887_v39  ;;  %v897_v47 = vand.u32 2147483647, %v887_v39  ;;  %vm893_vm7 = vweird.f32 %v887_v39 }
 0x9a2   :  { %1655 = vtanh.f32 %v882_v21  ;;  %v788_v24 = vmul.f32 %v787_v42, %v2028_v11 }
 0x9a3   :  { %v900_v49 = vor.u32 1.1754944e-38, %v899_v45  ;;  %vm898_vm10 = vcmp.eq.f32.partialorder %v897_v47, 8.507059e+37 }
 0x9a7   :  { %v1654_v43 = vpop.eup %1653 }
 0x9a8   :  { %v889_v44 = vmul.f32 %v1654_v43, %v887_v39  ;;  %vm894_vm6 = vweird.f32 %v1654_v43  ;;  %v1656_v52 = vpop.eup %1655 }
 0x9a9   :  { %vm895_vm9 = vmor %vm893_vm7, %vm894_vm6 }
 0x9aa   :  { %v890_v62 = vsub.f32 1.0, %v889_v44 }
 0x9ac   :  { %v891_v46 = vmul.f32 %v1654_v43, %v890_v62 }
 0x9ae   :  { %v892_v50 = vadd.f32 %v1654_v43, %v891_v46 }
 0x9b0   :  { %v896_v51 = vsel %vm895_vm9, %v1654_v43, %v892_v50 }
 0x9b1   :  { %v901_v53 = vsel %vm898_vm10, %v900_v49, %v896_v51 }
 0x9b2   :  { %v903_v54 = vsel %vm1866_vm8, %v1656_v52, %v901_v53 }
 0x9b3   :  { %906 = vrot.lane.b32.xlu2 %v903_v54, %s1707_s0  ;;  %v904_v63 = vmul.f32 %v903_v54, %v2037_v16  ;;  %v1028_v16 = vpop.f32.mrf.mxu3 }
 0x9b4   :  { %v1032_v8 = vpack.c.bf16 %v1028_v16, %v1028_v16 }
 0x9b6   :  { %1565 = vmatmul.msk.bf16.vlgmr.msra.gmra.mxu0 %vm198_vm2, %v1032_v8 }
 0x9bb   :  { %v1030_v12 = vpop.f32.mrf.mxu3 }
 0x9c3   :  { %v1189_v8 = vpop.f32.mrf.mxu3 }
 0xa0d   :  { %v907_v55 = vpop.permute.xlu2 %906 }
 0xa0e   :  { %v909_v56 = vmul.f32 %v907_v55, %v903_v54 }
 0xa10   :  { %911 = vrot.lane.b32.xlu1 %v909_v56, %s1708_s20 }
 0xa13   :  { %v791_v57 = vpop.permute.xlu0 %790 }
 0xa14   :  { %v793_v58 = vmul.f32 %v791_v57, %v787_v42 }
 0xa16   :  { %795 = vrot.lane.b32.xlu2 %v793_v58, %s1708_s20 }
 0xa1e   :  { %924 = vrot.lane.b32.xlu2 %v1558_v7, %s1709_s22 }
 0xa33   :  { %v1045_v17 = vpop.f32.mrf.mxu0 }
 0xa34   :  { %v1046_v27 = vadd.f32 %v1859_v31, %v1045_v17 }
 0xa3b   :  { %v1047_v18 = vpop.f32.mrf.mxu0 }
 0xa70   :  { %v796_v59 = vpop.permute.xlu2 %795 }
 0xa71   :  { %v2102_v60 = vadd.f32 %v796_v59, %v788_v24 }
 0xa73   :  { %1657 = vtanh.f32 %v2102_v60 }
 0xa78   :  { %v925_v9 = vpop.permute.xlu2 %924 }
 0xa79   :  { %v1658_v61 = vpop.eup %1657 }
 0xa7a   :  { %801 = vrot.lane.b32.xlu1 %v1658_v61, %s1707_s0 }
 0xa82   :  { %v912_v0 = vpop.permute.xlu1 %911 }
 0xa83   :  { %v2107_v1 = vadd.f32 %v912_v0, %v904_v63 }
 0xa85   :  { %1659 = vtanh.f32 %v2107_v1 }
 0xa8b   :  { %v1660_v2 = vpop.eup %1659 }
 0xa8c   :  { %917 = vrot.lane.b32.xlu0 %v1660_v2, %s1707_s0  ;;  %v1568_v2 = vld [vmem:[%s2234_s9 + $0x20] sm:$0xff] }
 0xaec   :  { %v802_v4 = vpop.permute.xlu1 %801 }
 0xaed   :  { %v804_v11 = vmul.f32 %v802_v4, %v787_v42 }
 0xaef   :  { %933 = vrot.lane.b32.xlu1 %v804_v11, %s1707_s0 }
 0xafe   :  { %v918_v5 = vpop.permute.xlu0 %917 }
 0xaff   :  { %v920_v23 = vmul.f32 %v918_v5, %v903_v54 }
 0xb01   :  { %v1049_v3 = vpack.c.bf16 %v920_v23, %v920_v23  ;;  %v927_v10 = vmul.f32 %v925_v9, %v920_v23 }
 0xb03   :  { %1051 = vrot.lane.b32.xlu2 %v1049_v3, %s1708_s20  ;;  %929 = vrot.lane.b32.xlu0 %v927_v10, %s1708_s20 }
 0xb5d   :  { %v1052_v22 = vpop.permute.xlu2 %1051 }
 0xb61   :  { %v934_v13 = vpop.permute.xlu1 %933 }
 0xb75   :  { %v930_v14 = vpop.permute.xlu0 %929 }
 0xb76   :  { %v936_v15 = vsel %vm281_vm14, %v930_v14, %v934_v13 }
 0xb77   :  { %v937_v41 = vpack.c.bf16 %v936_v15, %v936_v15 }
 0xb79   :  { %1559 = vmatmul.msk.bf16.vlgmr.msra.gmra.mxu1 %vm376_vm15, %v937_v41  ;;  %v1572_v41 = vld [vmem:[%s2230_s5 + $0x50] sm:$0xff] }
 0xb7a   :  { %1230 = vmatpush.bf16.msra.mxu1 %v1701_v20 }
 0xb89   :  { %1566 = vmatmul.msk.bf16.vlgmr.msrb.gmra.mxu1 %vm281_vm14, %v1052_v22  ;;  %v1573_v22 = vld [vmem:[%s2230_s5 + $0x58] sm:$0xff] }
 0xbf6   :  { %v950_v21 = vpop.f32.mrf.mxu1 }
 0xbf7   :  { %v951_v19 = vadd.f32 %v1935_v37, %v950_v21 }
 0xbf9   :  { %v1560_v25 = vmul.f32 -1.442695, %v951_v19 }
 0xbfb   :  { %1661 = vpow2.f32 %v1560_v25  ;;  %v1703_v25 = vld [vmem:[%s2231_s2] sm:$0xf] }
 0xbfe   :  { %v952_v28 = vpop.f32.mrf.mxu1 }
 0xc01   :  { %v1662_v26 = vpop.eup %1661 }
 0xc02   :  { %v958_v6 = vadd.f32 1.0, %v1662_v26 }
 0xc04   :  { %1663 = vrcp.f32 %v958_v6  ;;  %v970_v36 = vand.u32 2147483648, %v958_v6  ;;  %v968_v40 = vand.u32 2147483647, %v958_v6  ;;  %vm964_vm12 = vweird.f32 %v958_v6 }
 0xc06   :  { %v1065_v29 = vpop.f32.mrf.mxu1  ;;  %v971_v31 = vor.u32 1.1754944e-38, %v970_v36  ;;  %vm969_vm0 = vcmp.eq.f32.partialorder %v968_v40, 8.507059e+37 }
 0xc07   :  { %v1069_v38 = vadd.f32 %v1065_v29, %v1046_v27 }
 0xc09   :  { %v1567_v30 = vmul.f32 -1.442695, %v1069_v38 }
 0xc0a   :  { %v1664_v32 = vpop.eup %1663 }
 0xc0b   :  { %1665 = vpow2.f32 %v1567_v30  ;;  %v960_v33 = vmul.f32 %v1664_v32, %v958_v6  ;;  %vm965_vm11 = vweird.f32 %v1664_v32 }
 0xc0c   :  { %1667 = vtanh.f32 %v951_v19  ;;  %vm966_vm13 = vmor %vm964_vm12, %vm965_vm11 }
 0xc0d   :  { %v961_v34 = vsub.f32 1.0, %v960_v33 }
 0xc0e   :  { %v1067_v35 = vpop.f32.mrf.mxu1 }
 0xc0f   :  { %v962_v39 = vmul.f32 %v1664_v32, %v961_v34 }
 0xc11   :  { %v1666_v42 = vpop.eup %1665  ;;  %v963_v43 = vadd.f32 %v1664_v32, %v962_v39 }
 0xc12   :  { %v1074_v44 = vadd.f32 1.0, %v1666_v42  ;;  %v1668_v45 = vpop.eup %1667 }
 0xc13   :  { %v967_v62 = vsel %vm966_vm13, %v1664_v32, %v963_v43 }
 0xc14   :  { %1669 = vrcp.f32 %v1074_v44  ;;  %v972_v46 = vsel %vm969_vm0, %v971_v31, %v967_v62  ;;  %v1086_v52 = vand.u32 2147483648, %v1074_v44  ;;  %v1084_v54 = vand.u32 2147483647, %v1074_v44 }
 0xc15   :  { %v974_v47 = vsel %vm1866_vm8, %v1668_v45, %v972_v46  ;;  %1671 = vtanh.f32 %v1069_v38  ;;  %vm1080_vm4 = vweird.f32 %v1074_v44 }
 0xc16   :  { %977 = vrot.lane.b32.xlu1 %v974_v47, %s1707_s0  ;;  %v1087_v56 = vor.u32 1.1754944e-38, %v1086_v52  ;;  %vm1085_vm6 = vcmp.eq.f32.partialorder %v1084_v54, 8.507059e+37  ;;  %v975_v9 = vmul.f32 %v974_v47, %v2102_v60  ;;  %v1191_v60 = vpop.f32.mrf.mxu3 }
 0xc1a   :  { %v1670_v50 = vpop.eup %1669 }
 0xc1b   :  { %v1076_v49 = vmul.f32 %v1670_v50, %v1074_v44  ;;  %vm1081_vm3 = vweird.f32 %v1670_v50  ;;  %v1672_v58 = vpop.eup %1671 }
 0xc1c   :  { %vm1082_vm5 = vmor %vm1080_vm4, %vm1081_vm3 }
 0xc1d   :  { %v1077_v51 = vsub.f32 1.0, %v1076_v49  ;;  %v1704_v49 = vld [vmem:[%s2233_s7] ss:$0 sm:$0xff] }
 0xc1f   :  { %v1078_v53 = vmul.f32 %v1670_v50, %v1077_v51 }
 0xc21   :  { %v1079_v55 = vadd.f32 %v1670_v50, %v1078_v53 }
 0xc23   :  { %v1083_v57 = vsel %vm1082_vm5, %v1670_v50, %v1079_v55 }
 0xc24   :  { %v1088_v7 = vsel %vm1085_vm6, %v1087_v56, %v1083_v57 }
 0xc25   :  { %v1090_v24 = vsel %vm1866_vm8, %v1672_v58, %v1088_v7 }
 0xc26   :  { %1093 = vrot.lane.b32.xlu0 %v1090_v24, %s1707_s0  ;;  %v1091_v4 = vmul.f32 %v1090_v24, %v2107_v1  ;;  %v1702_v1 = vld [vmem:[%s2227_s4] ss:$0 sm:$0xff] }
 0xc27   :  { %v1190_v12 = vadd.f32 %v1702_v1, %v1189_v8  ;;  %v1192_v14 = vadd.f32 %v1702_v1, %v1191_v60 }
 0xc29   :  { %v1196_v13 = vmul.f32 0.01, %v1190_v12  ;;  %vm1194_vm7 = vcmp.ge.f32.partialorder %v1190_v12, 0.0  ;;  %vm1195_vm9 = vcmp.ge.f32.partialorder %v1192_v14, 0.0  ;;  %v1197_v20 = vmul.f32 0.01, %v1192_v14 }
 0xc2b   :  { %v1198_v15 = vsel %vm1194_vm7, %v1190_v12, %v1196_v13  ;;  %v1199_v17 = vsel %vm1195_vm9, %v1192_v14, %v1197_v20 }
 0xc2c   :  { %v1203_v18 = vmul.f32 %v1572_v41, %v1198_v15  ;;  %v1204_v21 = vmul.f32 %v1573_v22, %v1199_v17 }
 0xc2e   :  { %v1205_v19 = vpack.c.bf16 %v1204_v21, %v1203_v18 }
 0xc30   :  { %1213 = vmatpush.bf16.msrb.mxu0 %v1205_v19  ;;  %v1578_v19 = vld [vmem:[%s2234_s9 + $0x28] sm:$0xff] }
 0xc33   :  { %1574 = vmatmul.msk.bf16.vlgmr.msrb.gmra.mxu0 %vm198_vm2, %v1703_v25 }
 0xc88   :  { %v978_v59 = vpop.permute.xlu1 %977 }
 0xc89   :  { %v980_v61 = vmul.f32 %v978_v59, %v974_v47 }
 0xc8b   :  { %982 = vrot.lane.b32.xlu0 %v980_v61, %s1708_s20 }
 0xc93   :  { %1111 = vrot.lane.b32.xlu0 %v1568_v2, %s1709_s22 }
 0xc98   :  { %v1094_v63 = vpop.permute.xlu0 %1093 }
 0xc99   :  { %v1096_v0 = vmul.f32 %v1094_v63, %v1090_v24 }
 0xc9b   :  { %1098 = vrot.lane.b32.xlu2 %v1096_v0, %s1708_s20 }
 0xcb0   :  { %v1215_v32 = vpop.f32.mrf.mxu0 }
 0xcb1   :  { %v1219_v33 = vpack.c.bf16 %v1215_v32, %v1215_v32 }
 0xcb3   :  { %1575 = vmatmul.msk.bf16.vlgmr.msra.gmra.mxu1 %vm198_vm2, %v1219_v33 }
 0xcb8   :  { %v1217_v34 = vpop.f32.mrf.mxu0 }
 0xcf5   :  { %v1099_v11 = vpop.permute.xlu2 %1098 }
 0xcf6   :  { %v2136_v5 = vadd.f32 %v1099_v11, %v1091_v4 }
 0xcf8   :  { %1673 = vtanh.f32 %v2136_v5 }
 0xcfd   :  { %v983_v23 = vpop.permute.xlu0 %982 }
 0xcfe   :  { %v1674_v3 = vpop.eup %1673  ;;  %v2140_v10 = vadd.f32 %v983_v23, %v975_v9 }
 0xcff   :  { %1104 = vrot.lane.b32.xlu1 %v1674_v3, %s1707_s0 }
 0xd00   :  { %1675 = vtanh.f32 %v2140_v10 }
 0xd05   :  { %v1112_v27 = vpop.permute.xlu0 %1111 }
 0xd06   :  { %v1676_v16 = vpop.eup %1675 }
 0xd07   :  { %988 = vrot.lane.b32.xlu2 %v1676_v16, %s1707_s0 }
 0xd30   :  { %v1232_v43 = vpop.f32.mrf.mxu1 }
 0xd31   :  { %v1233_v51 = vadd.f32 %v1704_v49, %v1232_v43 }
 0xd38   :  { %v1234_v44 = vpop.f32.mrf.mxu1 }
 0xd61   :  { %v989_v28 = vpop.permute.xlu2 %988 }
 0xd62   :  { %v991_v26 = vmul.f32 %v989_v28, %v974_v47 }
 0xd64   :  { %1120 = vrot.lane.b32.xlu2 %v991_v26, %s1707_s0 }
 0xd71   :  { %v1105_v6 = vpop.permute.xlu1 %1104 }
 0xd72   :  { %v1107_v29 = vmul.f32 %v1105_v6, %v1090_v24 }
 0xd74   :  { %v1236_v38 = vpack.c.bf16 %v1107_v29, %v1107_v29  ;;  %v1114_v30 = vmul.f32 %v1112_v27, %v1107_v29 }
 0xd76   :  { %1238 = vrot.lane.b32.xlu0 %v1236_v38, %s1708_s20  ;;  %1116 = vrot.lane.b32.xlu1 %v1114_v30, %s1708_s20 }
 0xdbe   :  { %v1121_v35 = vpop.permute.xlu2 %1120 }
 0xde8   :  { %v1117_v36 = vpop.permute.xlu1 %1116  ;;  %v1239_v42 = vpop.permute.xlu0 %1238 }
 0xde9   :  { %v1123_v39 = vsel %vm281_vm14, %v1117_v36, %v1121_v35 }
 0xdea   :  { %v1124_v40 = vpack.c.bf16 %v1123_v39, %v1123_v39 }
 0xdec   :  { %1569 = vmatmul.msk.bf16.vlgmr.msrb.gmra.mxu2 %vm376_vm15, %v1124_v40 }
 0xdfc   :  { %1576 = vmatmul.msk.bf16.vlgmr.msra.gmra.mxu2 %vm281_vm14, %v1239_v42 }
 0xe6f   :  { %v1137_v31 = vpop.f32.mrf.mxu2 }
 0xe70   :  { %v1138_v62 = vadd.f32 %v1935_v37, %v1137_v31 }
 0xe72   :  { %v1570_v45 = vmul.f32 -1.442695, %v1138_v62 }
 0xe74   :  { %1677 = vpow2.f32 %v1570_v45  ;;  %v1705_v45 = vld [vmem:[%s2236_s11] ss:$0 sm:$0xff] }
 0xe77   :  { %v1139_v46 = vpop.f32.mrf.mxu2 }
 0xe7a   :  { %v1678_v47 = vpop.eup %1677 }
 0xe7b   :  { %v1145_v50 = vadd.f32 1.0, %v1678_v47 }
 0xe7d   :  { %1679 = vrcp.f32 %v1145_v50  ;;  %v1157_v58 = vand.u32 2147483648, %v1145_v50  ;;  %v1155_v24 = vand.u32 2147483647, %v1145_v50  ;;  %vm1151_vm10 = vweird.f32 %v1145_v50 }
 0xe7f   :  { %v1252_v52 = vpop.f32.mrf.mxu2  ;;  %v1158_v0 = vor.u32 1.1754944e-38, %v1157_v58  ;;  %vm1156_vm12 = vcmp.eq.f32.partialorder %v1155_v24, 8.507059e+37 }
 0xe80   :  { %v1256_v53 = vadd.f32 %v1252_v52, %v1233_v51 }
 0xe82   :  { %v1577_v54 = vmul.f32 -1.442695, %v1256_v53 }
 0xe83   :  { %v1680_v55 = vpop.eup %1679 }
 0xe84   :  { %1681 = vpow2.f32 %v1577_v54  ;;  %v1147_v56 = vmul.f32 %v1680_v55, %v1145_v50  ;;  %vm1152_vm2 = vweird.f32 %v1680_v55 }
 0xe85   :  { %1683 = vtanh.f32 %v1138_v62  ;;  %vm1153_vm11 = vmor %vm1151_vm10, %vm1152_vm2 }
 0xe86   :  { %v1148_v57 = vsub.f32 1.0, %v1147_v56 }
 0xe87   :  { %v1254_v37 = vpop.f32.mrf.mxu2 }
 0xe88   :  { %v1149_v7 = vmul.f32 %v1680_v55, %v1148_v57 }
 0xe8a   :  { %v1682_v59 = vpop.eup %1681  ;;  %v1150_v61 = vadd.f32 %v1680_v55, %v1149_v7 }
 0xe8b   :  { %v1261_v63 = vadd.f32 1.0, %v1682_v59  ;;  %v1684_v4 = vpop.eup %1683 }
 0xe8c   :  { %v1154_v2 = vsel %vm1153_vm11, %v1680_v55, %v1150_v61 }
 0xe8d   :  { %1685 = vrcp.f32 %v1261_v63  ;;  %v1159_v11 = vsel %vm1156_vm12, %v1158_v0, %v1154_v2  ;;  %v1273_v8 = vand.u32 2147483648, %v1261_v63  ;;  %v1271_v12 = vand.u32 2147483647, %v1261_v63  ;;  %v1366_v2 = vld [vmem:[%s2238_s12] sm:$0xff] }
 0xe8e   :  { %v1161_v9 = vsel %vm1866_vm8, %v1684_v4, %v1159_v11  ;;  %1687 = vtanh.f32 %v1256_v53  ;;  %vm1267_vm0 = vweird.f32 %v1261_v63 }
 0xe8f   :  { %1164 = vrot.lane.b32.xlu2 %v1161_v9, %s1707_s0  ;;  %v1274_v60 = vor.u32 1.1754944e-38, %v1273_v8  ;;  %vm1272_vm4 = vcmp.eq.f32.partialorder %v1271_v12, 8.507059e+37  ;;  %v1162_v25 = vmul.f32 %v1161_v9, %v2140_v10  ;;  %v1372_v10 = vld [vmem:[%s2237_s13] sm:$0xff] }
 0xe93   :  { %v1686_v23 = vpop.eup %1685 }
 0xe94   :  { %v1263_v3 = vmul.f32 %v1686_v23, %v1261_v63  ;;  %vm1268_vm13 = vweird.f32 %v1686_v23  ;;  %v1688_v15 = vpop.eup %1687 }
 0xe95   :  { %vm1269_vm3 = vmor %vm1267_vm0, %vm1268_vm13 }
 0xe96   :  { %v1264_v16 = vsub.f32 1.0, %v1263_v3 }
 0xe98   :  { %v1265_v1 = vmul.f32 %v1686_v23, %v1264_v16 }
 0xe9a   :  { %v1266_v13 = vadd.f32 %v1686_v23, %v1265_v1 }
 0xe9c   :  { %v1270_v14 = vsel %vm1269_vm3, %v1686_v23, %v1266_v13 }
 0xe9d   :  { %v1275_v41 = vsel %vm1272_vm4, %v1274_v60, %v1270_v14 }
 0xe9e   :  { %v1277_v20 = vsel %vm1866_vm8, %v1688_v15, %v1275_v41 }
 0xe9f   :  { %1280 = vrot.lane.b32.xlu1 %v1277_v20, %s1707_s0  ;;  %v1278_v27 = vmul.f32 %v1277_v20, %v2136_v5 }
 0xee9   :  { %v1165_v22 = vpop.permute.xlu2 %1164 }
 0xeea   :  { %v1167_v17 = vmul.f32 %v1165_v22, %v1161_v9 }
 0xeec   :  { %1169 = vrot.lane.b32.xlu1 %v1167_v17, %s1708_s20 }
 0xef4   :  { %1298 = vrot.lane.b32.xlu1 %v1578_v19, %s1709_s22  ;;  %v1405_v19 = vld [vmem:[%s2240_s15] sm:$0xff] }
 0xf11   :  { %v1281_v18 = vpop.permute.xlu1 %1280 }
 0xf12   :  { %v1283_v21 = vmul.f32 %v1281_v18, %v1277_v20 }
 0xf14   :  { %1285 = vrot.lane.b32.xlu0 %v1283_v21, %s1708_s20  ;;  %v1404_v21 = vld [vmem:[%s2239_s14] sm:$0xff] }
 0xf5e   :  { %v1170_v28 = vpop.permute.xlu1 %1169 }
 0xf5f   :  { %v1172_v26 = vadd.f32 %v1170_v28, %v1162_v25  ;;  %v22_v28 = vstv %s2241_s16 }
 0xf60   :  { %23 = vst [vmem:[#allocation2] sm:$0x1] %v22_v28 }
 0xf61   :  { %1689 = vtanh.f32 %v1172_v26 }
 0xf66   :  { %v1299_v35 = vpop.permute.xlu1 %1298 }
 0xf67   :  { %v1690_v6 = vpop.eup %1689 }
 0xf68   :  { %1175 = vrot.lane.b32.xlu0 %v1690_v6, %s1707_s0  ;;  %v1604_v6 = vld [vmem:[#allocation2] ss:$0 sm:$0xff] }
 0xf86   :  { %v1286_v29 = vpop.permute.xlu0 %1285 }
 0xf87   :  { %v1288_v38 = vadd.f32 %v1286_v29, %v1278_v27 }
 0xf89   :  { %1691 = vtanh.f32 %v1288_v38 }
 0xf8f   :  { %v1692_v30 = vpop.eup %1691 }
 0xf90   :  { %1291 = vrot.lane.b32.xlu2 %v1692_v30, %s1707_s0 }
 0xfda   :  { %v1176_v32 = vpop.permute.xlu0 %1175 }
 0xfdb   :  { %v1178_v33 = vmul.f32 %v1176_v32, %v1161_v9 }
 0xfdd   :  { %1307 = vrot.lane.b32.xlu0 %v1178_v33, %s1707_s0 }
 0xfe5   :  { %1374 = vrot.lane.b32.xlu0 %v1372_v10, %s1708_s20 }
 0xfea   :  { %v1292_v34 = vpop.permute.xlu2 %1291 }
 0xfeb   :  { %v1294_v36 = vmul.f32 %v1292_v34, %v1277_v20 }
 0xfed   :  { %v1301_v5 = vmul.f32 %v1299_v35, %v1294_v36 }
 0xfef   :  { %1303 = vrot.lane.b32.xlu2 %v1301_v5, %s1708_s20 }
0x1049   :  { %v1304_v39 = vpop.permute.xlu2 %1303 }
0x104f   :  { %v1308_v40 = vpop.permute.xlu0 %1307 }
0x1050   :  { %v1310_v42 = vsel %vm281_vm14, %v1304_v39, %v1308_v40 }
0x1051   :  { %v1311_v43 = vpack.c.bf16 %v1310_v42, %v1310_v42 }
0x1053   :  { %1579 = vmatmul.msk.bf16.vlgmr.msra.gmra.mxu3 %vm376_vm15, %v1311_v43 }
0x1057   :  { %v1375_v44 = vpop.permute.xlu0 %1374 }
0x1058   :  { %v1377_v31 = vmul.f32 %v1375_v44, %v1288_v38 }
0x105a   :  { %1379 = vrot.lane.b32.xlu0 %v1377_v31, %s1707_s0 }
0x10cc   :  { %v1380_v16 = vpop.permute.xlu0 %1379 }
0x10d6   :  { %v1324_v62 = vpop.f32.mrf.mxu3 }
0x10d7   :  { %v1325_v46 = vadd.f32 %v1705_v45, %v1324_v62 }
0x10d9   :  { %v1580_v47 = vmul.f32 -1.442695, %v1325_v46 }
0x10db   :  { %1693 = vpow2.f32 %v1580_v47 }
0x10de   :  { %v1326_v50 = vpop.f32.mrf.mxu3 }
0x10e1   :  { %v1694_v49 = vpop.eup %1693 }
0x10e2   :  { %v1332_v51 = vadd.f32 1.0, %v1694_v49 }
0x10e4   :  { %1695 = vrcp.f32 %v1332_v51  ;;  %v1344_v55 = vand.u32 2147483648, %v1332_v51  ;;  %v1342_v57 = vand.u32 2147483647, %v1332_v51  ;;  %vm1338_vm5 = vweird.f32 %v1332_v51 }
0x10e5   :  { %1697 = vtanh.f32 %v1325_v46 }
0x10e6   :  { %v1345_v58 = vor.u32 1.1754944e-38, %v1344_v55  ;;  %vm1343_vm7 = vcmp.eq.f32.partialorder %v1342_v57, 8.507059e+37 }
0x10ea   :  { %v1696_v52 = vpop.eup %1695 }
0x10eb   :  { %v1334_v53 = vmul.f32 %v1696_v52, %v1332_v51  ;;  %vm1339_vm15 = vweird.f32 %v1696_v52  ;;  %v1698_v24 = vpop.eup %1697 }
0x10ec   :  { %vm1340_vm6 = vmor %vm1338_vm5, %vm1339_vm15 }
0x10ed   :  { %v1335_v54 = vsub.f32 1.0, %v1334_v53 }
0x10ef   :  { %v1336_v56 = vmul.f32 %v1696_v52, %v1335_v54 }
0x10f1   :  { %v1337_v37 = vadd.f32 %v1696_v52, %v1336_v56 }
0x10f3   :  { %v1341_v7 = vsel %vm1340_vm6, %v1696_v52, %v1337_v37 }
0x10f4   :  { %v1346_v59 = vsel %vm1343_vm7, %v1345_v58, %v1341_v7 }
0x10f5   :  { %v1348_v61 = vsel %vm1866_vm8, %v1698_v24, %v1346_v59  ;;  %vm1457_vm8 = vcmask 7168  }
0x10f6   :  { %1351 = vrot.lane.b32.xlu1 %v1348_v61, %s1707_s0  ;;  %v1349_v4 = vmul.f32 %v1348_v61, %v1172_v26 }
0x1168   :  { %v1352_v63 = vpop.permute.xlu1 %1351 }
0x1169   :  { %v1354_v0 = vmul.f32 %v1352_v63, %v1348_v61 }
0x116b   :  { %1356 = vrot.lane.b32.xlu2 %v1354_v0, %s1708_s20 }
0x1173   :  { %1368 = vrot.lane.b32.xlu2 %v1366_v2, %s1709_s22 }
0x11c5   :  { %v1357_v11 = vpop.permute.xlu2 %1356 }
0x11c6   :  { %v1359_v9 = vadd.f32 %v1357_v11, %v1349_v4 }
0x11c8   :  { %1699 = vtanh.f32 %v1359_v9  ;;  %v1391_v1 = vmul.f32 %v1375_v44, %v1359_v9 }
0x11cd   :  { %v1369_v23 = vpop.permute.xlu2 %1368 }
0x11ce   :  { %v1700_v3 = vpop.eup %1699  ;;  %v1371_v48 = vmul.f32 %v1369_v23, %v1294_v36 }
0x11cf   :  { %1362 = vrot.lane.b32.xlu1 %v1700_v3, %s1707_s0 }
0x11d0   :  { %v1382_v8 = vadd.f32 %v1380_v16, %v1371_v48 }
0x11d2   :  { %1384 = vrot.lane.b32.xlu2 %v1382_v8, %s1708_s20 }
0x11d7   :  { %1393 = vrot.lane.b32.xlu1 %v1391_v1, %s1707_s0 }
0x122c   :  { %v1385_v12 = vpop.permute.xlu2 %1384 }
0x122d   :  { %v1387_v13 = vsel %vm281_vm14, %v1385_v12, 0.0 }
0x122e   :  { %1388 = vadd.xlane.f32.xlu1 %v1387_v13 }
0x1241   :  { %v1363_v60 = vpop.permute.xlu1 %1362 }
0x1242   :  { %v1365_v14 = vmul.f32 %v1363_v60, %v1348_v61 }
0x1244   :  { %v1390_v15 = vmul.f32 %v1369_v23, %v1365_v14 }
0x1249   :  { %v1394_v41 = vpop.permute.xlu1 %1393 }
0x124a   :  { %v1396_v20 = vadd.f32 %v1394_v41, %v1390_v15 }
0x124c   :  { %1398 = vrot.lane.b32.xlu0 %v1396_v20, %s1708_s20 }
0x12a1   :  { %v1389_v22 = vpop.xlane.xlu1 %1388 }
0x12a2   :  { %1447 = vmatpush.msrb.mxu1 %v1389_v22 }
0x12a3   :  { %1582 = vmatmul.msk.f32.vlgmr.msrb.gmra.mxu1 %vm122_vm1, %v1404_v21 }
0x12be   :  { %v1399_v17 = vpop.permute.xlu0 %1398 }
0x12bf   :  { %v1401_v18 = vsel %vm281_vm14, %v1399_v17, 0.0 }
0x12c0   :  { %1402 = vadd.xlane.f32.xlu2 %v1401_v18 }
0x1320   :  { %v1449_v26 = vpop.f32.mrf.mxu1 }
0x1333   :  { %v1403_v25 = vpop.xlane.xlu2 %1402 }
0x1334   :  { %1424 = vmatpush.msra.mxu0 %v1403_v25 }
0x1335   :  { %1581 = vmatmul.msk.f32.vlgmr.msra.gmra.mxu0 %vm122_vm1, %v1405_v19 }
0x13b2   :  { %v1426_v27 = vpop.f32.mrf.mxu0 }
0x13b3   :  { %v1450_v29 = vadd.f32 %v1449_v26, %v1426_v27 }
0x13b5   :  { %v1456_v38 = vadd.f32 %v1604_v6, %v1450_v29 }
0x13b7   :  { %1458 = vst.msk [vmem:[%s2242_s17] sm:$0xff] %vm1457_vm8, %v1456_v38 }

</bundles_post_ra>
